<compile_context>
chip_gen: v6e
topology: v6e:2x2x1
jax: 0.10.0
libtpu: 0.0.40
codegen_flags: <defaults>
</compile_context>

<pallas_src>
import functools

import jax
import jax.numpy as jnp
from jax.experimental import pallas as pl
from jax.experimental.pallas import tpu as pltpu

# Model hyper-parameters mirroring ShallowConvNet.__init__
KERN_T = 13        # temporal conv kernel (1, 13)
N_FILT = 40        # conv filters
POOL_K = 35        # AvgPool2d kernel (1, 35)
POOL_S = 7         # AvgPool2d stride (1, 7)
BN_EPS = 1e-5
LOG_CLAMP = 1e-6
NC_PAD = 128       # classifier output lanes padded to a full vreg lane width


def _shallow_kernel(x_ref, wf_ref, bf_ref, scale_ref, shift_ref,
                    pool_ref, wl_ref, bl_ref, o_ref,
                    *, t1, n_classes, tb):
    """Process TB batch elements per grid step; all operands live in VMEM."""
    wf = wf_ref[...]          # (40, 13*chans)  fused conv1*conv2 weight
    bf = bf_ref[...]          # (40, 1)         fused bias
    scale = scale_ref[...]    # (40, 1)         folded BN scale
    shift = shift_ref[...]    # (40, 1)         folded BN shift
    pool = pool_ref[...]      # (t1, p_out)     avg-pool matrix (1/35 per window)
    bl = bl_ref[...]          # (1, NC_PAD)     classifier bias (zero padded)
    wl = [wl_ref[nc] for nc in range(n_classes)]   # each (40, p_out)

    zpad = None
    if NC_PAD > n_classes:
        zpad = jnp.zeros((1, NC_PAD - n_classes), jnp.float32)

    rows = []
    for b in range(tb):                         # small, fully unrolled
        xb = x_ref[b]                           # (chans, samples)
        # im2col: rows ordered k*chans + c (matches wf column layout)
        cols = jnp.concatenate([xb[:, k:k + t1] for k in range(KERN_T)],
                               axis=0)          # (13*chans, t1)
        # fused conv1+conv2: ONE MXU matmul
        h = jnp.dot(wf, cols, preferred_element_type=jnp.float32) + bf   # (40, t1)
        # BatchNorm (inference, folded) + square activation
        y = h * scale + shift
        s = y * y
        # AvgPool2d (1,35)/(1,7) as ONE matmul, then one log on the full tile
        pooled = jnp.dot(s, pool, preferred_element_type=jnp.float32)    # (40, p_out)
        lg = jnp.log(jnp.maximum(pooled, LOG_CLAMP))                     # (40, p_out)
        # TODO(synk): Dropout is identity in eval mode; training-mode dropout and
        # BatchNorm batch-statistics are not implemented.
        # Classifier: per-class Frobenius inner product with (40, p_out) weights.
        pieces = []
        for nc in range(n_classes):
            prod = lg * wl[nc]                                           # (40, p_out)
            v = jnp.sum(jnp.sum(prod, axis=1, keepdims=True),
                        axis=0, keepdims=True)                           # (1, 1)
            pieces.append(v)
        if zpad is not None:
            pieces.append(zpad)
        rows.append(jnp.concatenate(pieces, axis=1) + bl)                # (1, NC_PAD)

    # single lane-dense store of the whole batch block
    o_ref[0] = jnp.concatenate(rows, axis=0)                             # (tb, NC_PAD)


def _full_spec(arr):
    nd = arr.ndim
    return pl.BlockSpec(arr.shape, lambda i, _nd=nd: (0,) * _nd)


def shallow_convnet_forward(x_nchw, params, *, tb=4):
    """x_nchw: (N, 1, Chans, Samples) float32 -> logits (N, n_classes)."""
    n, one, chans, samples = x_nchw.shape
    assert one == 1
    t1 = samples - KERN_T + 1
    assert t1 >= POOL_K, "Samples must be >= 47 so at least one pool window fits"
    n_classes = int(params["n_classes"])
    assert n_classes <= NC_PAD

    x = x_nchw[:, 0, :, :].astype(jnp.float32)        # (N, Chans, Samples)

    tb = max(1, min(tb, n))
    g = -(-n // tb)                                   # ceil(N / TB)
    n_pad = g * tb
    if n_pad != n:
        x = jnp.concatenate(
            [x, jnp.zeros((n_pad - n, chans, samples), jnp.float32)], axis=0)

    kernel = functools.partial(_shallow_kernel, t1=t1,
                               n_classes=n_classes, tb=tb)

    in_specs = [
        pl.BlockSpec((tb, chans, samples), lambda i: (i, 0, 0)),
        _full_spec(params["wf"]), _full_spec(params["bf"]),
        _full_spec(params["scale"]), _full_spec(params["shift"]),
        _full_spec(params["pool"]), _full_spec(params["wl"]),
        _full_spec(params["bl"]),
    ]

    out = pl.pallas_call(
        kernel,
        out_shape=jax.ShapeDtypeStruct((g, tb, NC_PAD), jnp.float32),
        grid=(g,),
        in_specs=in_specs,
        out_specs=pl.BlockSpec((1, tb, NC_PAD), lambda i: (i, 0, 0)),
        compiler_params=pltpu.CompilerParams(
            dimension_semantics=("parallel",),
            vmem_limit_bytes=32 * 1024 * 1024),
    )(x, params["wf"], params["bf"], params["scale"], params["shift"],
      params["pool"], params["wl"], params["bl"])

    return out.reshape(n_pad, NC_PAD)[:n, :n_classes]


def init_params(key, chans, samples, n_classes):
    """Deterministic synthetic parameters; returns (kernel_params, raw_params)."""
    t1 = samples - KERN_T + 1
    p_out = (t1 - POOL_K) // POOL_S + 1
    feat_dim = N_FILT * p_out
    ks = jax.random.split(key, 6)

    # MaskConv2d(1, 40, (1, 13)): weight (40,1,1,13), neuron_mask = ones, bias (40,)
    w1_t = jax.random.normal(ks[0], (N_FILT, 1, 1, KERN_T), jnp.float32) * 0.1
    m1 = jnp.ones_like(w1_t)
    b1 = jax.random.normal(ks[1], (N_FILT,), jnp.float32) * 0.1

    # MaskConv2d(40, 40, (Chans, 1)): weight (40,40,Chans,1), mask = ones, bias (40,)
    w2_t = jax.random.normal(ks[2], (N_FILT, N_FILT, chans, 1), jnp.float32) * 0.1
    m2 = jnp.ones_like(w2_t)
    b2 = jax.random.normal(ks[3], (N_FILT,), jnp.float32) * 0.1

    # BatchNorm2d(40), inference with PyTorch defaults: gamma=1, beta=0, mean=0, var=1
    gamma = jnp.ones((N_FILT,), jnp.float32)
    beta = jnp.zeros((N_FILT,), jnp.float32)
    rmean = jnp.zeros((N_FILT,), jnp.float32)
    rvar = jnp.ones((N_FILT,), jnp.float32)
    scale = gamma / jnp.sqrt(rvar + BN_EPS)
    shift = beta - rmean * scale

    # MaskLinear(40 * p_out, n_classes): weight (n_classes, feat_dim), mask = ones
    wl_t = jax.random.normal(ks[4], (n_classes, feat_dim), jnp.float32) * 0.1
    ml = jnp.ones_like(wl_t)
    bl = jax.random.normal(ks[5], (n_classes,), jnp.float32) * 0.1

    w1 = (w1_t * m1).reshape(N_FILT, KERN_T)      # (40, 13)       [f, k]
    w2 = (w2_t * m2)[:, :, :, 0]                  # (40, 40, chans)[g, f, c]
    wl = wl_t * ml                                # (n_classes, 40*p_out)

    # ---- fold conv1 into conv2: single fused matmul weight / bias ----
    #   wf[g, k*chans + c] = sum_f w2[g,f,c] * w1[f,k]
    #   bf[g]              = b2[g] + sum_{f,c} w2[g,f,c] * b1[f]
    wf = jnp.einsum('gfc,fk->gkc', w2, w1).reshape(N_FILT, KERN_T * chans)
    bf = b2 + jnp.einsum('gfc,f->g', w2, b1)

    # ---- average pool as a constant (t1, p_out) matmul ----
    t_idx = jnp.arange(t1)[:, None]
    p_idx = jnp.arange(p_out)[None, :]
    pool = ((t_idx >= p_idx * POOL_S) &
            (t_idx < p_idx * POOL_S + POOL_K)).astype(jnp.float32) / POOL_K

    # ---- classifier in per-class (40, p_out) layout (matches NCHW flatten) ----
    wl3 = wl.reshape(n_classes, N_FILT, p_out)
    bl_pad = jnp.zeros((1, NC_PAD), jnp.float32).at[0, :n_classes].set(bl)

    kernel_params = dict(
        wf=wf, bf=bf.reshape(N_FILT, 1),
        scale=scale.reshape(N_FILT, 1), shift=shift.reshape(N_FILT, 1),
        pool=pool, wl=wl3, bl=bl_pad, n_classes=n_classes,
    )
    raw_params = dict(w1=w1, b1=b1, w2=w2, b2=b2,
                      scale=scale, shift=shift, wl=wl, bl=bl)
    return kernel_params, raw_params


def reference_forward(x_nchw, raw):
    """Pure-JAX (XLA) reference of the unfused PyTorch forward, eval mode."""
    x = x_nchw[:, 0].astype(jnp.float32)              # (N, C, S)
    n, chans, samples = x.shape
    t1 = samples - KERN_T + 1
    p_out = (t1 - POOL_K) // POOL_S + 1
    wins = jnp.stack([x[:, :, k:k + t1] for k in range(KERN_T)], axis=-1)  # (N,C,t1,13)
    out1 = jnp.einsum('nctk,fk->nfct', wins, raw["w1"],
                      precision='highest') + raw["b1"][None, :, None, None]
    out2 = jnp.einsum('nfct,gfc->ngt', out1, raw["w2"],
                      precision='highest') + raw["b2"][None, :, None]
    y = out2 * raw["scale"][None, :, None] + raw["shift"][None, :, None]
    s = y * y
    pooled = jnp.stack(
        [jnp.mean(s[:, :, p * POOL_S:p * POOL_S + POOL_K], axis=-1)
         for p in range(p_out)], axis=-1)              # (N, 40, p_out)
    lg = jnp.log(jnp.maximum(pooled, LOG_CLAMP))
    feat = lg.reshape(n, N_FILT * p_out)
    return jnp.dot(feat, raw["wl"].T, precision='highest') + raw["bl"][None, :]


if __name__ == "__main__":
    # Samples=61 -> t1=49, p_out=3; batch=8 with TB=4 -> grid of 2 steps.
    batch, chans, samples, n_classes = 8, 4, 61, 3
    key = jax.random.PRNGKey(0)
    kx, kp = jax.random.split(key)

    x = jax.random.normal(kx, (batch, 1, chans, samples), jnp.float32)
    params, raw = init_params(kp, chans, samples, n_classes)

    out = shallow_convnet_forward(x, params, tb=4)
    out = jax.block_until_ready(out)
    assert out.shape == (batch, n_classes)
    assert bool(jnp.all(jnp.isfinite(out)))

    ref = reference_forward(x, raw)
    assert bool(jnp.allclose(out, ref, rtol=5e-2, atol=5e-2)), (
        "max abs err = %f" % float(jnp.max(jnp.abs(out - ref))))
    print("KERNEL_OK")
</pallas_src>

<mosaic_0001>
module attributes {stable_mosaic.version = 11 : i64} {
  func.func @_shallow_kernel(%arg0: i32, %arg1: memref<4x4x61xf32, #tpu.memory_space<vmem>>, %arg2: memref<40x52xf32, #tpu.memory_space<vmem>>, %arg3: memref<40x1xf32, #tpu.memory_space<vmem>>, %arg4: memref<40x1xf32, #tpu.memory_space<vmem>>, %arg5: memref<40x1xf32, #tpu.memory_space<vmem>>, %arg6: memref<49x3xf32, #tpu.memory_space<vmem>>, %arg7: memref<3x40x3xf32, #tpu.memory_space<vmem>>, %arg8: memref<1x128xf32, #tpu.memory_space<vmem>>, %arg9: memref<1x4x128xf32, #tpu.memory_space<vmem>>) attributes {dimension_semantics = [#tpu.dimension_semantics<parallel>], iteration_bounds = array<i64: 2>, scalar_prefetch = 0 : i64, scratch_operands = 0 : i64, tpu.core_type = #tpu.core_type<tc>, window_params = [{transform_indices = @transform_0, window_bounds = array<i64: 4, 4, 61>}, {pipeline_mode = #tpu.pipeline_mode<synchronous>, transform_indices = @transform_1, window_bounds = array<i64: 40, 52>}, {pipeline_mode = #tpu.pipeline_mode<synchronous>, transform_indices = @transform_2, window_bounds = array<i64: 40, 1>}, {pipeline_mode = #tpu.pipeline_mode<synchronous>, transform_indices = @transform_3, window_bounds = array<i64: 40, 1>}, {pipeline_mode = #tpu.pipeline_mode<synchronous>, transform_indices = @transform_4, window_bounds = array<i64: 40, 1>}, {pipeline_mode = #tpu.pipeline_mode<synchronous>, transform_indices = @transform_5, window_bounds = array<i64: 49, 3>}, {pipeline_mode = #tpu.pipeline_mode<synchronous>, transform_indices = @transform_6, window_bounds = array<i64: 3, 40, 3>}, {pipeline_mode = #tpu.pipeline_mode<synchronous>, transform_indices = @transform_7, window_bounds = array<i64: 1, 128>}, {transform_indices = @transform_8, window_bounds = array<i64: 1, 4, 128>}]} {
    %c0 = arith.constant 0 : index
    %c0_0 = arith.constant 0 : index
    %0 = vector.load %arg2[%c0, %c0_0] : memref<40x52xf32, #tpu.memory_space<vmem>>, vector<40x52xf32>
    %c0_1 = arith.constant 0 : index
    %c0_2 = arith.constant 0 : index
    %1 = vector.load %arg3[%c0_1, %c0_2] : memref<40x1xf32, #tpu.memory_space<vmem>>, vector<40x1xf32>
    %c0_3 = arith.constant 0 : index
    %c0_4 = arith.constant 0 : index
    %2 = vector.load %arg4[%c0_3, %c0_4] : memref<40x1xf32, #tpu.memory_space<vmem>>, vector<40x1xf32>
    %c0_5 = arith.constant 0 : index
    %c0_6 = arith.constant 0 : index
    %3 = vector.load %arg5[%c0_5, %c0_6] : memref<40x1xf32, #tpu.memory_space<vmem>>, vector<40x1xf32>
    %c0_7 = arith.constant 0 : index
    %c0_8 = arith.constant 0 : index
    %4 = vector.load %arg6[%c0_7, %c0_8] : memref<49x3xf32, #tpu.memory_space<vmem>>, vector<49x3xf32>
    %c0_9 = arith.constant 0 : index
    %c0_10 = arith.constant 0 : index
    %5 = vector.load %arg8[%c0_9, %c0_10] : memref<1x128xf32, #tpu.memory_space<vmem>>, vector<1x128xf32>
    %c0_11 = arith.constant 0 : index
    %c0_12 = arith.constant 0 : index
    %c0_13 = arith.constant 0 : index
    %6 = vector.load %arg7[%c0_11, %c0_12, %c0_13] : memref<3x40x3xf32, #tpu.memory_space<vmem>>, vector<1x40x3xf32>
    %7 = vector.shape_cast %6 : vector<1x40x3xf32> to vector<40x3xf32>
    %c1 = arith.constant 1 : index
    %c0_14 = arith.constant 0 : index
    %c0_15 = arith.constant 0 : index
    %8 = vector.load %arg7[%c1, %c0_14, %c0_15] : memref<3x40x3xf32, #tpu.memory_space<vmem>>, vector<1x40x3xf32>
    %9 = vector.shape_cast %8 : vector<1x40x3xf32> to vector<40x3xf32>
    %c2 = arith.constant 2 : index
    %c0_16 = arith.constant 0 : index
    %c0_17 = arith.constant 0 : index
    %10 = vector.load %arg7[%c2, %c0_16, %c0_17] : memref<3x40x3xf32, #tpu.memory_space<vmem>>, vector<1x40x3xf32>
    %11 = vector.shape_cast %10 : vector<1x40x3xf32> to vector<40x3xf32>
    %cst = arith.constant 0.000000e+00 : f32
    %12 = vector.broadcast %cst : f32 to vector<1x125xf32>
    %c0_18 = arith.constant 0 : index
    %c0_19 = arith.constant 0 : index
    %c0_20 = arith.constant 0 : index
    %13 = vector.load %arg1[%c0_18, %c0_19, %c0_20] : memref<4x4x61xf32, #tpu.memory_space<vmem>>, vector<1x4x61xf32>
    %14 = vector.shape_cast %13 : vector<1x4x61xf32> to vector<4x61xf32>
    %15 = vector.extract_strided_slice %14 {offsets = [0, 0], sizes = [4, 49], strides = [1, 1]} : vector<4x61xf32> to vector<4x49xf32>
    %16 = vector.extract_strided_slice %14 {offsets = [0, 1], sizes = [4, 49], strides = [1, 1]} : vector<4x61xf32> to vector<4x49xf32>
    %17 = vector.extract_strided_slice %14 {offsets = [0, 2], sizes = [4, 49], strides = [1, 1]} : vector<4x61xf32> to vector<4x49xf32>
    %18 = vector.extract_strided_slice %14 {offsets = [0, 3], sizes = [4, 49], strides = [1, 1]} : vector<4x61xf32> to vector<4x49xf32>
    %19 = vector.extract_strided_slice %14 {offsets = [0, 4], sizes = [4, 49], strides = [1, 1]} : vector<4x61xf32> to vector<4x49xf32>
    %20 = vector.extract_strided_slice %14 {offsets = [0, 5], sizes = [4, 49], strides = [1, 1]} : vector<4x61xf32> to vector<4x49xf32>
    %21 = vector.extract_strided_slice %14 {offsets = [0, 6], sizes = [4, 49], strides = [1, 1]} : vector<4x61xf32> to vector<4x49xf32>
    %22 = vector.extract_strided_slice %14 {offsets = [0, 7], sizes = [4, 49], strides = [1, 1]} : vector<4x61xf32> to vector<4x49xf32>
    %23 = vector.extract_strided_slice %14 {offsets = [0, 8], sizes = [4, 49], strides = [1, 1]} : vector<4x61xf32> to vector<4x49xf32>
    %24 = vector.extract_strided_slice %14 {offsets = [0, 9], sizes = [4, 49], strides = [1, 1]} : vector<4x61xf32> to vector<4x49xf32>
    %25 = vector.extract_strided_slice %14 {offsets = [0, 10], sizes = [4, 49], strides = [1, 1]} : vector<4x61xf32> to vector<4x49xf32>
    %26 = vector.extract_strided_slice %14 {offsets = [0, 11], sizes = [4, 49], strides = [1, 1]} : vector<4x61xf32> to vector<4x49xf32>
    %27 = vector.extract_strided_slice %14 {offsets = [0, 12], sizes = [4, 49], strides = [1, 1]} : vector<4x61xf32> to vector<4x49xf32>
    %28 = tpu.concatenate %15, %16, %17, %18, %19, %20, %21, %22, %23, %24, %25, %26, %27 in 0 : vector<4x49xf32>, vector<4x49xf32>, vector<4x49xf32>, vector<4x49xf32>, vector<4x49xf32>, vector<4x49xf32>, vector<4x49xf32>, vector<4x49xf32>, vector<4x49xf32>, vector<4x49xf32>, vector<4x49xf32>, vector<4x49xf32>, vector<4x49xf32> -> vector<52x49xf32>
    %cst_21 = arith.constant dense<0.000000e+00> : vector<40x49xf32>
    %29 = tpu.matmul %0, %28, %cst_21 {dimension_numbers = #tpu.dot_dimension_numbers<[1], [0], [0], [1], [0, 0, 1, 1], [], []>} : vector<40x52xf32>, vector<52x49xf32>, vector<40x49xf32> -> vector<40x49xf32>
    %30 = vector.broadcast %1 : vector<40x1xf32> to vector<40x49xf32>
    %31 = arith.addf %29, %30 : vector<40x49xf32>
    %32 = vector.broadcast %2 : vector<40x1xf32> to vector<40x49xf32>
    %33 = arith.mulf %31, %32 : vector<40x49xf32>
    %34 = vector.broadcast %3 : vector<40x1xf32> to vector<40x49xf32>
    %35 = arith.addf %33, %34 : vector<40x49xf32>
    %36 = arith.mulf %35, %35 : vector<40x49xf32>
    %cst_22 = arith.constant dense<0.000000e+00> : vector<40x3xf32>
    %37 = tpu.matmul %36, %4, %cst_22 {dimension_numbers = #tpu.dot_dimension_numbers<[1], [0], [0], [1], [0, 0, 1, 1], [], []>} : vector<40x49xf32>, vector<49x3xf32>, vector<40x3xf32> -> vector<40x3xf32>
    %cst_23 = arith.constant 9.99999997E-7 : f32
    %38 = vector.broadcast %cst_23 : f32 to vector<40x3xf32>
    %39 = arith.maximumf %37, %38 : vector<40x3xf32>
    %40 = math.log %39 : vector<40x3xf32>
    %41 = arith.mulf %40, %7 : vector<40x3xf32>
    %cst_24 = arith.constant dense<0.000000e+00> : vector<40xf32>
    %42 = vector.multi_reduction <add>, %41, %cst_24 [1] : vector<40x3xf32> to vector<40xf32>
    %43 = vector.shape_cast %42 : vector<40xf32> to vector<40x1xf32>
    %cst_25 = arith.constant dense<0.000000e+00> : vector<1xf32>
    %44 = vector.multi_reduction <add>, %43, %cst_25 [0] : vector<40x1xf32> to vector<1xf32>
    %45 = vector.shape_cast %44 : vector<1xf32> to vector<1x1xf32>
    %46 = arith.mulf %40, %9 : vector<40x3xf32>
    %cst_26 = arith.constant dense<0.000000e+00> : vector<40xf32>
    %47 = vector.multi_reduction <add>, %46, %cst_26 [1] : vector<40x3xf32> to vector<40xf32>
    %48 = vector.shape_cast %47 : vector<40xf32> to vector<40x1xf32>
    %cst_27 = arith.constant dense<0.000000e+00> : vector<1xf32>
    %49 = vector.multi_reduction <add>, %48, %cst_27 [0] : vector<40x1xf32> to vector<1xf32>
    %50 = vector.shape_cast %49 : vector<1xf32> to vector<1x1xf32>
    %51 = arith.mulf %40, %11 : vector<40x3xf32>
    %cst_28 = arith.constant dense<0.000000e+00> : vector<40xf32>
    %52 = vector.multi_reduction <add>, %51, %cst_28 [1] : vector<40x3xf32> to vector<40xf32>
    %53 = vector.shape_cast %52 : vector<40xf32> to vector<40x1xf32>
    %cst_29 = arith.constant dense<0.000000e+00> : vector<1xf32>
    %54 = vector.multi_reduction <add>, %53, %cst_29 [0] : vector<40x1xf32> to vector<1xf32>
    %55 = vector.shape_cast %54 : vector<1xf32> to vector<1x1xf32>
    %56 = tpu.concatenate %45, %50, %55, %12 in 1 : vector<1x1xf32>, vector<1x1xf32>, vector<1x1xf32>, vector<1x125xf32> -> vector<1x128xf32>
    %57 = arith.addf %56, %5 : vector<1x128xf32>
    %c1_30 = arith.constant 1 : index
    %c0_31 = arith.constant 0 : index
    %c0_32 = arith.constant 0 : index
    %58 = vector.load %arg1[%c1_30, %c0_31, %c0_32] : memref<4x4x61xf32, #tpu.memory_space<vmem>>, vector<1x4x61xf32>
    %59 = vector.shape_cast %58 : vector<1x4x61xf32> to vector<4x61xf32>
    %60 = vector.extract_strided_slice %59 {offsets = [0, 0], sizes = [4, 49], strides = [1, 1]} : vector<4x61xf32> to vector<4x49xf32>
    %61 = vector.extract_strided_slice %59 {offsets = [0, 1], sizes = [4, 49], strides = [1, 1]} : vector<4x61xf32> to vector<4x49xf32>
    %62 = vector.extract_strided_slice %59 {offsets = [0, 2], sizes = [4, 49], strides = [1, 1]} : vector<4x61xf32> to vector<4x49xf32>
    %63 = vector.extract_strided_slice %59 {offsets = [0, 3], sizes = [4, 49], strides = [1, 1]} : vector<4x61xf32> to vector<4x49xf32>
    %64 = vector.extract_strided_slice %59 {offsets = [0, 4], sizes = [4, 49], strides = [1, 1]} : vector<4x61xf32> to vector<4x49xf32>
    %65 = vector.extract_strided_slice %59 {offsets = [0, 5], sizes = [4, 49], strides = [1, 1]} : vector<4x61xf32> to vector<4x49xf32>
    %66 = vector.extract_strided_slice %59 {offsets = [0, 6], sizes = [4, 49], strides = [1, 1]} : vector<4x61xf32> to vector<4x49xf32>
    %67 = vector.extract_strided_slice %59 {offsets = [0, 7], sizes = [4, 49], strides = [1, 1]} : vector<4x61xf32> to vector<4x49xf32>
    %68 = vector.extract_strided_slice %59 {offsets = [0, 8], sizes = [4, 49], strides = [1, 1]} : vector<4x61xf32> to vector<4x49xf32>
    %69 = vector.extract_strided_slice %59 {offsets = [0, 9], sizes = [4, 49], strides = [1, 1]} : vector<4x61xf32> to vector<4x49xf32>
    %70 = vector.extract_strided_slice %59 {offsets = [0, 10], sizes = [4, 49], strides = [1, 1]} : vector<4x61xf32> to vector<4x49xf32>
    %71 = vector.extract_strided_slice %59 {offsets = [0, 11], sizes = [4, 49], strides = [1, 1]} : vector<4x61xf32> to vector<4x49xf32>
    %72 = vector.extract_strided_slice %59 {offsets = [0, 12], sizes = [4, 49], strides = [1, 1]} : vector<4x61xf32> to vector<4x49xf32>
    %73 = tpu.concatenate %60, %61, %62, %63, %64, %65, %66, %67, %68, %69, %70, %71, %72 in 0 : vector<4x49xf32>, vector<4x49xf32>, vector<4x49xf32>, vector<4x49xf32>, vector<4x49xf32>, vector<4x49xf32>, vector<4x49xf32>, vector<4x49xf32>, vector<4x49xf32>, vector<4x49xf32>, vector<4x49xf32>, vector<4x49xf32>, vector<4x49xf32> -> vector<52x49xf32>
    %cst_33 = arith.constant dense<0.000000e+00> : vector<40x49xf32>
    %74 = tpu.matmul %0, %73, %cst_33 {dimension_numbers = #tpu.dot_dimension_numbers<[1], [0], [0], [1], [0, 0, 1, 1], [], []>} : vector<40x52xf32>, vector<52x49xf32>, vector<40x49xf32> -> vector<40x49xf32>
    %75 = vector.broadcast %1 : vector<40x1xf32> to vector<40x49xf32>
    %76 = arith.addf %74, %75 : vector<40x49xf32>
    %77 = vector.broadcast %2 : vector<40x1xf32> to vector<40x49xf32>
    %78 = arith.mulf %76, %77 : vector<40x49xf32>
    %79 = vector.broadcast %3 : vector<40x1xf32> to vector<40x49xf32>
    %80 = arith.addf %78, %79 : vector<40x49xf32>
    %81 = arith.mulf %80, %80 : vector<40x49xf32>
    %cst_34 = arith.constant dense<0.000000e+00> : vector<40x3xf32>
    %82 = tpu.matmul %81, %4, %cst_34 {dimension_numbers = #tpu.dot_dimension_numbers<[1], [0], [0], [1], [0, 0, 1, 1], [], []>} : vector<40x49xf32>, vector<49x3xf32>, vector<40x3xf32> -> vector<40x3xf32>
    %cst_35 = arith.constant 9.99999997E-7 : f32
    %83 = vector.broadcast %cst_35 : f32 to vector<40x3xf32>
    %84 = arith.maximumf %82, %83 : vector<40x3xf32>
    %85 = math.log %84 : vector<40x3xf32>
    %86 = arith.mulf %85, %7 : vector<40x3xf32>
    %cst_36 = arith.constant dense<0.000000e+00> : vector<40xf32>
    %87 = vector.multi_reduction <add>, %86, %cst_36 [1] : vector<40x3xf32> to vector<40xf32>
    %88 = vector.shape_cast %87 : vector<40xf32> to vector<40x1xf32>
    %cst_37 = arith.constant dense<0.000000e+00> : vector<1xf32>
    %89 = vector.multi_reduction <add>, %88, %cst_37 [0] : vector<40x1xf32> to vector<1xf32>
    %90 = vector.shape_cast %89 : vector<1xf32> to vector<1x1xf32>
    %91 = arith.mulf %85, %9 : vector<40x3xf32>
    %cst_38 = arith.constant dense<0.000000e+00> : vector<40xf32>
    %92 = vector.multi_reduction <add>, %91, %cst_38 [1] : vector<40x3xf32> to vector<40xf32>
    %93 = vector.shape_cast %92 : vector<40xf32> to vector<40x1xf32>
    %cst_39 = arith.constant dense<0.000000e+00> : vector<1xf32>
    %94 = vector.multi_reduction <add>, %93, %cst_39 [0] : vector<40x1xf32> to vector<1xf32>
    %95 = vector.shape_cast %94 : vector<1xf32> to vector<1x1xf32>
    %96 = arith.mulf %85, %11 : vector<40x3xf32>
    %cst_40 = arith.constant dense<0.000000e+00> : vector<40xf32>
    %97 = vector.multi_reduction <add>, %96, %cst_40 [1] : vector<40x3xf32> to vector<40xf32>
    %98 = vector.shape_cast %97 : vector<40xf32> to vector<40x1xf32>
    %cst_41 = arith.constant dense<0.000000e+00> : vector<1xf32>
    %99 = vector.multi_reduction <add>, %98, %cst_41 [0] : vector<40x1xf32> to vector<1xf32>
    %100 = vector.shape_cast %99 : vector<1xf32> to vector<1x1xf32>
    %101 = tpu.concatenate %90, %95, %100, %12 in 1 : vector<1x1xf32>, vector<1x1xf32>, vector<1x1xf32>, vector<1x125xf32> -> vector<1x128xf32>
    %102 = arith.addf %101, %5 : vector<1x128xf32>
    %c2_42 = arith.constant 2 : index
    %c0_43 = arith.constant 0 : index
    %c0_44 = arith.constant 0 : index
    %103 = vector.load %arg1[%c2_42, %c0_43, %c0_44] : memref<4x4x61xf32, #tpu.memory_space<vmem>>, vector<1x4x61xf32>
    %104 = vector.shape_cast %103 : vector<1x4x61xf32> to vector<4x61xf32>
    %105 = vector.extract_strided_slice %104 {offsets = [0, 0], sizes = [4, 49], strides = [1, 1]} : vector<4x61xf32> to vector<4x49xf32>
    %106 = vector.extract_strided_slice %104 {offsets = [0, 1], sizes = [4, 49], strides = [1, 1]} : vector<4x61xf32> to vector<4x49xf32>
    %107 = vector.extract_strided_slice %104 {offsets = [0, 2], sizes = [4, 49], strides = [1, 1]} : vector<4x61xf32> to vector<4x49xf32>
    %108 = vector.extract_strided_slice %104 {offsets = [0, 3], sizes = [4, 49], strides = [1, 1]} : vector<4x61xf32> to vector<4x49xf32>
    %109 = vector.extract_strided_slice %104 {offsets = [0, 4], sizes = [4, 49], strides = [1, 1]} : vector<4x61xf32> to vector<4x49xf32>
    %110 = vector.extract_strided_slice %104 {offsets = [0, 5], sizes = [4, 49], strides = [1, 1]} : vector<4x61xf32> to vector<4x49xf32>
    %111 = vector.extract_strided_slice %104 {offsets = [0, 6], sizes = [4, 49], strides = [1, 1]} : vector<4x61xf32> to vector<4x49xf32>
    %112 = vector.extract_strided_slice %104 {offsets = [0, 7], sizes = [4, 49], strides = [1, 1]} : vector<4x61xf32> to vector<4x49xf32>
    %113 = vector.extract_strided_slice %104 {offsets = [0, 8], sizes = [4, 49], strides = [1, 1]} : vector<4x61xf32> to vector<4x49xf32>
    %114 = vector.extract_strided_slice %104 {offsets = [0, 9], sizes = [4, 49], strides = [1, 1]} : vector<4x61xf32> to vector<4x49xf32>
    %115 = vector.extract_strided_slice %104 {offsets = [0, 10], sizes = [4, 49], strides = [1, 1]} : vector<4x61xf32> to vector<4x49xf32>
    %116 = vector.extract_strided_slice %104 {offsets = [0, 11], sizes = [4, 49], strides = [1, 1]} : vector<4x61xf32> to vector<4x49xf32>
    %117 = vector.extract_strided_slice %104 {offsets = [0, 12], sizes = [4, 49], strides = [1, 1]} : vector<4x61xf32> to vector<4x49xf32>
    %118 = tpu.concatenate %105, %106, %107, %108, %109, %110, %111, %112, %113, %114, %115, %116, %117 in 0 : vector<4x49xf32>, vector<4x49xf32>, vector<4x49xf32>, vector<4x49xf32>, vector<4x49xf32>, vector<4x49xf32>, vector<4x49xf32>, vector<4x49xf32>, vector<4x49xf32>, vector<4x49xf32>, vector<4x49xf32>, vector<4x49xf32>, vector<4x49xf32> -> vector<52x49xf32>
    %cst_45 = arith.constant dense<0.000000e+00> : vector<40x49xf32>
    %119 = tpu.matmul %0, %118, %cst_45 {dimension_numbers = #tpu.dot_dimension_numbers<[1], [0], [0], [1], [0, 0, 1, 1], [], []>} : vector<40x52xf32>, vector<52x49xf32>, vector<40x49xf32> -> vector<40x49xf32>
    %120 = vector.broadcast %1 : vector<40x1xf32> to vector<40x49xf32>
    %121 = arith.addf %119, %120 : vector<40x49xf32>
    %122 = vector.broadcast %2 : vector<40x1xf32> to vector<40x49xf32>
    %123 = arith.mulf %121, %122 : vector<40x49xf32>
    %124 = vector.broadcast %3 : vector<40x1xf32> to vector<40x49xf32>
    %125 = arith.addf %123, %124 : vector<40x49xf32>
    %126 = arith.mulf %125, %125 : vector<40x49xf32>
    %cst_46 = arith.constant dense<0.000000e+00> : vector<40x3xf32>
    %127 = tpu.matmul %126, %4, %cst_46 {dimension_numbers = #tpu.dot_dimension_numbers<[1], [0], [0], [1], [0, 0, 1, 1], [], []>} : vector<40x49xf32>, vector<49x3xf32>, vector<40x3xf32> -> vector<40x3xf32>
    %cst_47 = arith.constant 9.99999997E-7 : f32
    %128 = vector.broadcast %cst_47 : f32 to vector<40x3xf32>
    %129 = arith.maximumf %127, %128 : vector<40x3xf32>
    %130 = math.log %129 : vector<40x3xf32>
    %131 = arith.mulf %130, %7 : vector<40x3xf32>
    %cst_48 = arith.constant dense<0.000000e+00> : vector<40xf32>
    %132 = vector.multi_reduction <add>, %131, %cst_48 [1] : vector<40x3xf32> to vector<40xf32>
    %133 = vector.shape_cast %132 : vector<40xf32> to vector<40x1xf32>
    %cst_49 = arith.constant dense<0.000000e+00> : vector<1xf32>
    %134 = vector.multi_reduction <add>, %133, %cst_49 [0] : vector<40x1xf32> to vector<1xf32>
    %135 = vector.shape_cast %134 : vector<1xf32> to vector<1x1xf32>
    %136 = arith.mulf %130, %9 : vector<40x3xf32>
    %cst_50 = arith.constant dense<0.000000e+00> : vector<40xf32>
    %137 = vector.multi_reduction <add>, %136, %cst_50 [1] : vector<40x3xf32> to vector<40xf32>
    %138 = vector.shape_cast %137 : vector<40xf32> to vector<40x1xf32>
    %cst_51 = arith.constant dense<0.000000e+00> : vector<1xf32>
    %139 = vector.multi_reduction <add>, %138, %cst_51 [0] : vector<40x1xf32> to vector<1xf32>
    %140 = vector.shape_cast %139 : vector<1xf32> to vector<1x1xf32>
    %141 = arith.mulf %130, %11 : vector<40x3xf32>
    %cst_52 = arith.constant dense<0.000000e+00> : vector<40xf32>
    %142 = vector.multi_reduction <add>, %141, %cst_52 [1] : vector<40x3xf32> to vector<40xf32>
    %143 = vector.shape_cast %142 : vector<40xf32> to vector<40x1xf32>
    %cst_53 = arith.constant dense<0.000000e+00> : vector<1xf32>
    %144 = vector.multi_reduction <add>, %143, %cst_53 [0] : vector<40x1xf32> to vector<1xf32>
    %145 = vector.shape_cast %144 : vector<1xf32> to vector<1x1xf32>
    %146 = tpu.concatenate %135, %140, %145, %12 in 1 : vector<1x1xf32>, vector<1x1xf32>, vector<1x1xf32>, vector<1x125xf32> -> vector<1x128xf32>
    %147 = arith.addf %146, %5 : vector<1x128xf32>
    %c3 = arith.constant 3 : index
    %c0_54 = arith.constant 0 : index
    %c0_55 = arith.constant 0 : index
    %148 = vector.load %arg1[%c3, %c0_54, %c0_55] : memref<4x4x61xf32, #tpu.memory_space<vmem>>, vector<1x4x61xf32>
    %149 = vector.shape_cast %148 : vector<1x4x61xf32> to vector<4x61xf32>
    %150 = vector.extract_strided_slice %149 {offsets = [0, 0], sizes = [4, 49], strides = [1, 1]} : vector<4x61xf32> to vector<4x49xf32>
    %151 = vector.extract_strided_slice %149 {offsets = [0, 1], sizes = [4, 49], strides = [1, 1]} : vector<4x61xf32> to vector<4x49xf32>
    %152 = vector.extract_strided_slice %149 {offsets = [0, 2], sizes = [4, 49], strides = [1, 1]} : vector<4x61xf32> to vector<4x49xf32>
    %153 = vector.extract_strided_slice %149 {offsets = [0, 3], sizes = [4, 49], strides = [1, 1]} : vector<4x61xf32> to vector<4x49xf32>
    %154 = vector.extract_strided_slice %149 {offsets = [0, 4], sizes = [4, 49], strides = [1, 1]} : vector<4x61xf32> to vector<4x49xf32>
    %155 = vector.extract_strided_slice %149 {offsets = [0, 5], sizes = [4, 49], strides = [1, 1]} : vector<4x61xf32> to vector<4x49xf32>
    %156 = vector.extract_strided_slice %149 {offsets = [0, 6], sizes = [4, 49], strides = [1, 1]} : vector<4x61xf32> to vector<4x49xf32>
    %157 = vector.extract_strided_slice %149 {offsets = [0, 7], sizes = [4, 49], strides = [1, 1]} : vector<4x61xf32> to vector<4x49xf32>
    %158 = vector.extract_strided_slice %149 {offsets = [0, 8], sizes = [4, 49], strides = [1, 1]} : vector<4x61xf32> to vector<4x49xf32>
    %159 = vector.extract_strided_slice %149 {offsets = [0, 9], sizes = [4, 49], strides = [1, 1]} : vector<4x61xf32> to vector<4x49xf32>
    %160 = vector.extract_strided_slice %149 {offsets = [0, 10], sizes = [4, 49], strides = [1, 1]} : vector<4x61xf32> to vector<4x49xf32>
    %161 = vector.extract_strided_slice %149 {offsets = [0, 11], sizes = [4, 49], strides = [1, 1]} : vector<4x61xf32> to vector<4x49xf32>
    %162 = vector.extract_strided_slice %149 {offsets = [0, 12], sizes = [4, 49], strides = [1, 1]} : vector<4x61xf32> to vector<4x49xf32>
    %163 = tpu.concatenate %150, %151, %152, %153, %154, %155, %156, %157, %158, %159, %160, %161, %162 in 0 : vector<4x49xf32>, vector<4x49xf32>, vector<4x49xf32>, vector<4x49xf32>, vector<4x49xf32>, vector<4x49xf32>, vector<4x49xf32>, vector<4x49xf32>, vector<4x49xf32>, vector<4x49xf32>, vector<4x49xf32>, vector<4x49xf32>, vector<4x49xf32> -> vector<52x49xf32>
    %cst_56 = arith.constant dense<0.000000e+00> : vector<40x49xf32>
    %164 = tpu.matmul %0, %163, %cst_56 {dimension_numbers = #tpu.dot_dimension_numbers<[1], [0], [0], [1], [0, 0, 1, 1], [], []>} : vector<40x52xf32>, vector<52x49xf32>, vector<40x49xf32> -> vector<40x49xf32>
    %165 = vector.broadcast %1 : vector<40x1xf32> to vector<40x49xf32>
    %166 = arith.addf %164, %165 : vector<40x49xf32>
    %167 = vector.broadcast %2 : vector<40x1xf32> to vector<40x49xf32>
    %168 = arith.mulf %166, %167 : vector<40x49xf32>
    %169 = vector.broadcast %3 : vector<40x1xf32> to vector<40x49xf32>
    %170 = arith.addf %168, %169 : vector<40x49xf32>
    %171 = arith.mulf %170, %170 : vector<40x49xf32>
    %cst_57 = arith.constant dense<0.000000e+00> : vector<40x3xf32>
    %172 = tpu.matmul %171, %4, %cst_57 {dimension_numbers = #tpu.dot_dimension_numbers<[1], [0], [0], [1], [0, 0, 1, 1], [], []>} : vector<40x49xf32>, vector<49x3xf32>, vector<40x3xf32> -> vector<40x3xf32>
    %cst_58 = arith.constant 9.99999997E-7 : f32
    %173 = vector.broadcast %cst_58 : f32 to vector<40x3xf32>
    %174 = arith.maximumf %172, %173 : vector<40x3xf32>
    %175 = math.log %174 : vector<40x3xf32>
    %176 = arith.mulf %175, %7 : vector<40x3xf32>
    %cst_59 = arith.constant dense<0.000000e+00> : vector<40xf32>
    %177 = vector.multi_reduction <add>, %176, %cst_59 [1] : vector<40x3xf32> to vector<40xf32>
    %178 = vector.shape_cast %177 : vector<40xf32> to vector<40x1xf32>
    %cst_60 = arith.constant dense<0.000000e+00> : vector<1xf32>
    %179 = vector.multi_reduction <add>, %178, %cst_60 [0] : vector<40x1xf32> to vector<1xf32>
    %180 = vector.shape_cast %179 : vector<1xf32> to vector<1x1xf32>
    %181 = arith.mulf %175, %9 : vector<40x3xf32>
    %cst_61 = arith.constant dense<0.000000e+00> : vector<40xf32>
    %182 = vector.multi_reduction <add>, %181, %cst_61 [1] : vector<40x3xf32> to vector<40xf32>
    %183 = vector.shape_cast %182 : vector<40xf32> to vector<40x1xf32>
    %cst_62 = arith.constant dense<0.000000e+00> : vector<1xf32>
    %184 = vector.multi_reduction <add>, %183, %cst_62 [0] : vector<40x1xf32> to vector<1xf32>
    %185 = vector.shape_cast %184 : vector<1xf32> to vector<1x1xf32>
    %186 = arith.mulf %175, %11 : vector<40x3xf32>
    %cst_63 = arith.constant dense<0.000000e+00> : vector<40xf32>
    %187 = vector.multi_reduction <add>, %186, %cst_63 [1] : vector<40x3xf32> to vector<40xf32>
    %188 = vector.shape_cast %187 : vector<40xf32> to vector<40x1xf32>
    %cst_64 = arith.constant dense<0.000000e+00> : vector<1xf32>
    %189 = vector.multi_reduction <add>, %188, %cst_64 [0] : vector<40x1xf32> to vector<1xf32>
    %190 = vector.shape_cast %189 : vector<1xf32> to vector<1x1xf32>
    %191 = tpu.concatenate %180, %185, %190, %12 in 1 : vector<1x1xf32>, vector<1x1xf32>, vector<1x1xf32>, vector<1x125xf32> -> vector<1x128xf32>
    %192 = arith.addf %191, %5 : vector<1x128xf32>
    %193 = tpu.concatenate %57, %102, %147, %192 in 0 : vector<1x128xf32>, vector<1x128xf32>, vector<1x128xf32>, vector<1x128xf32> -> vector<4x128xf32>
    %c0_65 = arith.constant 0 : index
    %c0_66 = arith.constant 0 : index
    %c0_67 = arith.constant 0 : index
    %194 = vector.load %arg9[%c0_65, %c0_66, %c0_67] : memref<1x4x128xf32, #tpu.memory_space<vmem>>, vector<1x4x128xf32>
    %195 = vector.shape_cast %194 : vector<1x4x128xf32> to vector<4x128xf32>
    %196 = vector.shape_cast %193 : vector<4x128xf32> to vector<1x4x128xf32>
    tpu.vector_store %arg9[%c0_65, %c0_66, %c0_67], %196 {strides = array<i32>} : memref<1x4x128xf32, #tpu.memory_space<vmem>>, vector<1x4x128xf32>,
    return
  }
  func.func @transform_0(%arg0: i32) -> (i32, i32, i32) {
    %c0_i32 = arith.constant 0 : i32
    %c0_i32_0 = arith.constant 0 : i32
    %c0_i32_1 = arith.constant 0 : i32
    return %arg0, %c0_i32, %c0_i32_0 : i32, i32, i32
  }
  func.func @transform_1(%arg0: i32) -> (i32, i32) {
    %c0_i32 = arith.constant 0 : i32
    %c0_i32_0 = arith.constant 0 : i32
    %c0_i32_1 = arith.constant 0 : i32
    return %c0_i32, %c0_i32_0 : i32, i32
  }
  func.func @transform_2(%arg0: i32) -> (i32, i32) {
    %c0_i32 = arith.constant 0 : i32
    %c0_i32_0 = arith.constant 0 : i32
    %c0_i32_1 = arith.constant 0 : i32
    return %c0_i32, %c0_i32_0 : i32, i32
  }
  func.func @transform_3(%arg0: i32) -> (i32, i32) {
    %c0_i32 = arith.constant 0 : i32
    %c0_i32_0 = arith.constant 0 : i32
    %c0_i32_1 = arith.constant 0 : i32
    return %c0_i32, %c0_i32_0 : i32, i32
  }
  func.func @transform_4(%arg0: i32) -> (i32, i32) {
    %c0_i32 = arith.constant 0 : i32
    %c0_i32_0 = arith.constant 0 : i32
    %c0_i32_1 = arith.constant 0 : i32
    return %c0_i32, %c0_i32_0 : i32, i32
  }
  func.func @transform_5(%arg0: i32) -> (i32, i32) {
    %c0_i32 = arith.constant 0 : i32
    %c0_i32_0 = arith.constant 0 : i32
    %c0_i32_1 = arith.constant 0 : i32
    return %c0_i32, %c0_i32_0 : i32, i32
  }
  func.func @transform_6(%arg0: i32) -> (i32, i32, i32) {
    %c0_i32 = arith.constant 0 : i32
    %c0_i32_0 = arith.constant 0 : i32
    %c0_i32_1 = arith.constant 0 : i32
    %c0_i32_2 = arith.constant 0 : i32
    return %c0_i32, %c0_i32_0, %c0_i32_1 : i32, i32, i32
  }
  func.func @transform_7(%arg0: i32) -> (i32, i32) {
    %c0_i32 = arith.constant 0 : i32
    %c0_i32_0 = arith.constant 0 : i32
    %c0_i32_1 = arith.constant 0 : i32
    return %c0_i32, %c0_i32_0 : i32, i32
  }
  func.func @transform_8(%arg0: i32) -> (i32, i32, i32) {
    %c0_i32 = arith.constant 0 : i32
    %c0_i32_0 = arith.constant 0 : i32
    %c0_i32_1 = arith.constant 0 : i32
    return %arg0, %c0_i32, %c0_i32_0 : i32, i32, i32
  }
}

</mosaic_0001>

<bundles_post_ra>
// kernel: tpu_custom_call.1
= control target key start
LH: loop header
LB: loop body
LE: loop exit
PB: predicated region body
PF: predicated region fallthrough
CT: control target
= control target key end

     0   :  { %13 = vsyncpa [#allocation3], 0  ;;  %s3478_s0 = inlined_call_operand.vmem [shape: f32[8,4,61], index: 0, kind: input, shape index: {}]   ;;  %s3479_s1 = inlined_call_operand.vmem [shape: f32[40,52], index: 1, kind: input, shape index: {}]   ;;  %s3480_s2 = inlined_call_operand.vmem [shape: f32[40,1], index: 2, kind: input, shape index: {}]   ;;  %s3481_s3 = inlined_call_operand.vmem [shape: f32[40,1], index: 3, kind: input, shape index: {}]   ;;  %s3482_s4 = inlined_call_operand.vmem [shape: f32[40,1], index: 4, kind: input, shape index: {}]   ;;  %s3483_s5 = inlined_call_operand.vmem [shape: f32[49,3], index: 5, kind: input, shape index: {}]   ;;  %s3484_s6 = inlined_call_operand.vmem [shape: f32[3,40,3], index: 6, kind: input, shape index: {}]   ;;  %s3485_s7 = inlined_call_operand.vmem [shape: f32[1,128], index: 7, kind: input, shape index: {}]   ;;  %s3486_s8 = inlined_call_operand.hbm [shape: f32[2,4,128], index: 8, kind: output, shape index: {}]  }
   0x1   :  { %15 = vsyncpa [#allocation3 + $0x1], 0  ;;  %s2621_s27 = smov 0   ;;  %s2623_s28 = smov 0  }
   0x2   :  { %s2625_s29 = smov 0   ;;  %s2627_s30 = smov 0  }
   0x3 LB: > { %s2642_s9 = sadd.s32 4294967295, %s2558_s30   ;;  %s2002_s10 = sadd.s32 4294967294, %s2558_s30   ;;  %s2558_s30 = sphi %s2627_s30, %s3492_s30   ;;  %s2554_s29 = sphi %s2625_s29, %s3491_s29   ;;  %s2550_s28 = sphi %s2623_s28, %s3490_s28   ;;  %s2546_s27 = sphi %s2621_s27, %s3489_s27  }
   0x4   : > { %s2646_s11 = sadd.s32 1, %s2558_s30   ;;  %s201_s12 = sadd.s32 1, %s2554_s29 }
   0x5   : > { %s198_s13 = ssub.s32 %s2558_s30, %s2646_s11  ;;  %p211_p0 = scmp.ne.s32.totalorder %s2554_s29, %s2550_s28 }
   0x6   : > { %p199_p1 = scmp.eq.s32.totalorder %s198_s13, 0  ;;  %p212_p2 = scmp.eq.s32.totalorder %s2642_s9, 1 }
   0x7   : > { %p217_p3 = scmp.ne.s32.totalorder %s2550_s28, %s2546_s27  ;;  %p218_p4 = scmp.eq.s32.totalorder %s2002_s10, 1 }
   0x8   : > { %s2657_s14 = scalar_select %p199_p1, %s2554_s29, %s201_s12  }
   0x9   : > { %p2659_p5 = por %p212_p2, %p211_p0  ;;  %p2663_p6 = por %p218_p4, %p217_p3 }
   0xa   : > { %p2005_p7 = scmp.ge.s32.totalorder %s2558_s30, 1  ;;  %p266_p8 = scmp.lt.s32.totalorder %s2558_s30, 3 }
   0xc   : > { %p267_p9 = pnand %p2005_p7, %p266_p8 }
   0xd   : > { %s2007_s17 = sshll.u32 (!%p267_p9), %s2642_s9, 2  ;;  %s2561_s22 = smov (!%p267_p9), 120  }
   0xe   : > { %270 = sbr.rel (%p267_p9) target bundleno = 869 (0x365), region = 52  ;;  %p301_p10 = scmp.lt.s32.totalorder (!%p267_p9), %s2007_s17, 7 }
   0xf   : > { %s2562_s23 = smov (!%p267_p9), 116   ;;  %s2563_s24 = smov (!%p267_p9), 122  }
  0x10   : > { %s2564_s25 = smov (!%p267_p9), 118   ;;  %s2565_s26 = smov (!%p267_p9), 119  }
  0x11   : > { %s2566_s10 = smov (!%p267_p9), 117   ;;  %s2568_s12 = smov (!%p267_p9), 121  }
  0x12   : > { %s2569_s13 = smov (!%p267_p9), 124   ;;  %s2572_s19 = smov (!%p267_p9), 125  }
  0x13   : > { %v2560_v0 = vmov 0.0   ;;  %s3494_s17 = smov (!%p301_p10, %s2007_s17), 7  ;;  %vm2567_vm0 = vmmov 0   ;;  %s2573_s20 = smov 127   ;;  %v2574_v7 = vmov 0   ;;  %v316_v10 = vld [vmem:[%s3481_s3] sm:$0xff] }
  0x14   : > { %2170 = vmatprep.subr.mxu0 %v2560_v0  ;;  %2199 = vmatprep.subr.mxu1 %v2560_v0  ;;  %s2008_s18 = sshll.u32 %s3494_s17, 2  ;;  %s2570_s17 = smov 123   ;;  %v311_v11 = vld [vmem:[%s3480_s2] sm:$0xff]  ;;  %v312_v12 = vld [vmem:[%s3480_s2 + $0x8] sm:$0xff]  ;;  %v313_v15 = vld [vmem:[%s3480_s2 + $0x10] sm:$0xff]  ;;  %vm610_vm1 = vcmask 1040384  }
  0x15   : > { %s2675_s21 = scalar_lea.vmem %s3478_s0, %s2008_s18  ;;  %2184 = vmatprep.mubr.msk.f32.mxu0 %vm2567_vm0, %v2560_v0  ;;  %2213 = vmatprep.mubr.msk.f32.mxu1 %vm2567_vm0, %v2560_v0  ;;  %s2571_s18 = smov 126   ;;  %v321_v13 = vld [vmem:[%s3482_s4] sm:$0xff]  ;;  %v317_v14 = vld [vmem:[%s3481_s3 + $0x8] sm:$0xff]  ;;  %v318_v17 = vld [vmem:[%s3481_s3 + $0x10] sm:$0xff]  ;;  %vm389_vm2 = vcmask 1043456   ;;  %vm421_vm3 = vcmask 424960  }
  0x16   : > { %v2678_v1 = vld [vmem:[%s2675_s21] sm:$0xf]  ;;  %v2704_v3 = vld [vmem:[%s2675_s21 + $0x4] sm:$0xf]  ;;  %v2726_v5 = vld [vmem:[%s2675_s21 + $0x8] sm:$0xf]  ;;  %2457 = vset.pattern.permute.xlu1 %v2574_v7  ;;  %2456 = vset.pattern.permute.xlu0 %v2574_v7 }
  0x17   : > { %375 = vrot.lane.b32.xlu1 %v2678_v1, %s2561_s22  ;;  %387 = vrot.lane.b32.xlu0 %v2678_v1, %s2562_s23  ;;  %v353_v2 = vrot.slane %v2678_v1, 4  ;;  %v819_v4 = vrot.slane %v2704_v3, 4  ;;  %v1185_v6 = vrot.slane %v2726_v5, 4  ;;  %v2748_v8 = vld [vmem:[%s2675_s21 + $0xc] sm:$0xf]  ;;  %v314_v18 = vld [vmem:[%s3480_s2 + $0x18] sm:$0xff] }
  0x18   : > { %v1551_v9 = vrot.slane %v2748_v8, 4  ;;  %v322_v16 = vld [vmem:[%s3482_s4 + $0x8] sm:$0xff]  ;;  %v323_v19 = vld [vmem:[%s3482_s4 + $0x10] sm:$0xff]  ;;  %v319_v21 = vld [vmem:[%s3481_s3 + $0x18] sm:$0xff]  ;;  %vm594_vm4 = vcmask 400384   ;;  %vm724_vm5 = vcmask 23552  }
  0x19   : > { %v2802_v20 = vld [vmem:[%s3483_s5 + $0x30] sm:$0x1]  ;;  %v315_v24 = vld [vmem:[%s3480_s2 + $0x20] sm:$0xff]  ;;  %v2817_v25 = vld [vmem:[%s3483_s5 + $0x28] sm:$0xff]  ;;  %vm810_vm6 = vcmask 7168   ;;  %vm812_vm7 = vcmask 15360  }
  0x1a   : > { %2200 = vmatpush3.msk.msra.mxu1 %vm610_vm1, %v2802_v20  ;;  %v2823_v26 = vld [vmem:[%s3483_s5 + $0x20] sm:$0xff]  ;;  %v324_v27 = vld [vmem:[%s3482_s4 + $0x18] sm:$0xff]  ;;  %v2863_v49 = vld [vmem:[%s3479_s1 + $0x8] sm:$0xff]  ;;  %vm1924_vm8 = vcmask 1041408   ;;  %vm1926_vm9 = vcmask 1042432  }
  0x1b   : > { %369 = vrot.lane.b32.xlu1 %v2678_v1, %s2563_s24  ;;  %381 = vrot.lane.b32.xlu0 %v2678_v1, %s2564_s25  ;;  %v320_v30 = vld [vmem:[%s3481_s3 + $0x20] sm:$0xff]  ;;  %v2875_v53 = vld [vmem:[%s3479_s1 + $0x10] sm:$0xff] }
  0x1c   : > { %2201 = vmatprep.subr.mxu1 %v2560_v0  ;;  %v325_v31 = vld [vmem:[%s3482_s4 + $0x20] sm:$0xff]  ;;  %v2886_v57 = vld [vmem:[%s3479_s1 + $0x18] sm:$0xff] }
  0x1d   : > { %2202 = vmatpush3.msra.mxu1 %v2817_v25  ;;  %v2852_v46 = vld [vmem:[%s3479_s1] sm:$0xff] }
  0x1e   : > { %2203 = vmatprep.subr.mxu1 %v2560_v0  ;;  %v2897_v61 = vld [vmem:[%s3479_s1 + $0x20] sm:$0xff] }
  0x1f   : > { %378 = vrot.lane.b32.xlu0 %v353_v2, %s2565_s26  ;;  %384 = vrot.lane.b32.xlu1 %v353_v2, %s2566_s10 }
  0x20   : > { %2204 = vmatpush3.msra.mxu1 %v2823_v26 }
  0x21   : > { %2205 = vmatprep.subr.mxu1 %v2560_v0 }
  0x23   : > { %372 = vrot.lane.b32.xlu0 %v353_v2, %s2568_s12  ;;  %363 = vrot.lane.b32.xlu1 %v2678_v1, %s2569_s13 }
  0x27   : > { %366 = vrot.lane.b32.xlu0 %v353_v2, %s2570_s17  ;;  %357 = vrot.lane.b32.xlu1 %v2678_v1, %s2571_s18 }
  0x2b   : > { %360 = vrot.lane.b32.xlu0 %v353_v2, %s2572_s19  ;;  %354 = vrot.lane.b32.xlu1 %v353_v2, %s2573_s20 }
  0x2f   : > { %853 = vrot.lane.b32.xlu0 %v2704_v3, %s2562_s23  ;;  %847 = vrot.lane.b32.xlu1 %v2704_v3, %s2564_s25 }
  0x33   : > { %850 = vrot.lane.b32.xlu0 %v819_v4, %s2566_s10  ;;  %841 = vrot.lane.b32.xlu1 %v2704_v3, %s2561_s22 }
  0x37   : > { %844 = vrot.lane.b32.xlu0 %v819_v4, %s2565_s26  ;;  %835 = vrot.lane.b32.xlu1 %v2704_v3, %s2563_s24 }
  0x3b   : > { %838 = vrot.lane.b32.xlu0 %v819_v4, %s2568_s12  ;;  %829 = vrot.lane.b32.xlu1 %v2704_v3, %s2569_s13 }
  0x3f   : > { %832 = vrot.lane.b32.xlu0 %v819_v4, %s2570_s17  ;;  %823 = vrot.lane.b32.xlu1 %v2704_v3, %s2571_s18 }
  0x43   : > { %826 = vrot.lane.b32.xlu0 %v819_v4, %s2572_s19  ;;  %820 = vrot.lane.b32.xlu1 %v819_v4, %s2573_s20 }
  0x47   : > { %1219 = vrot.lane.b32.xlu0 %v2726_v5, %s2562_s23  ;;  %1213 = vrot.lane.b32.xlu1 %v2726_v5, %s2564_s25 }
  0x4b   : > { %1216 = vrot.lane.b32.xlu0 %v1185_v6, %s2566_s10  ;;  %1207 = vrot.lane.b32.xlu1 %v2726_v5, %s2561_s22 }
  0x4f   : > { %1210 = vrot.lane.b32.xlu0 %v1185_v6, %s2565_s26  ;;  %1201 = vrot.lane.b32.xlu1 %v2726_v5, %s2563_s24 }
  0x53   : > { %1204 = vrot.lane.b32.xlu0 %v1185_v6, %s2568_s12  ;;  %1195 = vrot.lane.b32.xlu1 %v2726_v5, %s2569_s13 }
  0x57   : > { %1198 = vrot.lane.b32.xlu0 %v1185_v6, %s2570_s17  ;;  %1189 = vrot.lane.b32.xlu1 %v2726_v5, %s2571_s18 }
  0x5b   : > { %1192 = vrot.lane.b32.xlu0 %v1185_v6, %s2572_s19  ;;  %1186 = vrot.lane.b32.xlu1 %v1185_v6, %s2573_s20 }
  0x5f   : > { %1585 = vrot.lane.b32.xlu0 %v2748_v8, %s2562_s23  ;;  %1579 = vrot.lane.b32.xlu1 %v2748_v8, %s2564_s25 }
  0x63   : > { %1582 = vrot.lane.b32.xlu0 %v1551_v9, %s2566_s10  ;;  %1573 = vrot.lane.b32.xlu1 %v2748_v8, %s2561_s22 }
  0x67   : > { %1576 = vrot.lane.b32.xlu0 %v1551_v9, %s2565_s26  ;;  %1567 = vrot.lane.b32.xlu1 %v2748_v8, %s2563_s24 }
  0x6b   : > { %1570 = vrot.lane.b32.xlu0 %v1551_v9, %s2568_s12  ;;  %1561 = vrot.lane.b32.xlu1 %v2748_v8, %s2569_s13  ;;  %s297_s13 = sand.u32 1, %s2550_s28  }
  0x6c   : > { %s1930_s24 = scalar_lea.sflag [#allocation3], %s297_s13 }
  0x6f   : > { %1564 = vrot.lane.b32.xlu0 %v1551_v9, %s2570_s17  ;;  %1555 = vrot.lane.b32.xlu1 %v2748_v8, %s2571_s18  ;;  %s2006_s17 = sshll.u32 %s297_s13, 2  ;;  %s2071_s18 = sshll.u32 %s2642_s9, 6 }
  0x70   : > { %s3443_s23 = scalar_lea.hbm %s3486_s8, %s2071_s18  ;;  %s2575_s9 = smov [#allocation2]  }
  0x71   : > { %s2502_s26 = sshll.u32 %s2575_s9, 4  ;;  %s2503_s26 = int_to_ptr.vmem [resolvable:$false] %s2502_s26 }
  0x72   : > { %s2504_s10 = scalar_lea.vmem %s2503_s26, 128 }
  0x73   : > { %1558 = vrot.lane.b32.xlu0 %v1551_v9, %s2572_s19  ;;  %1552 = vrot.lane.b32.xlu1 %v1551_v9, %s2573_s20  ;;  %s299_s19 = scalar_lea.vmem [#allocation2], %s2006_s17 }
  0x74   : > { %s1943_s20 = sshll.u32 %s299_s19, 4  ;;  %s1944_s20 = int_to_ptr.vmem [resolvable:$true] %s1943_s20 }
  0x75   : > { %s2498_s25 = scalar_lea.vmem %s1944_s20, 64  ;;  %p2505_p0 = scmp.lt.s32.totalorder %s1944_s20, %s2503_s26 }
  0x76   : > { %p2499_p11 = scmp.ne.s32.totalorder %s1944_s20, %s2498_s25  ;;  %p2506_p1 = scmp.lt.s32.totalorder %s2504_s10, %s2498_s25 }
  0x77   : > { %531 = vperm.xlu1 %2457, %v316_v10   ;;  %398 = vperm.xlu0 %2456, %v311_v11  }
  0x78   : > { %p2500_p12 = pnand %p2499_p11, %p2659_p5  ;;  %p2507_p2 = por %p2506_p1, %p2505_p0 }
  0x7a   : > { %p2501_p13 = pneg %p2500_p12 }
  0x7b   : > { %403 = vperm.xlu1 %2457, %v312_v12   ;;  %561 = vperm.xlu0 %2456, %v321_v13  }
  0x7c   : > { %p2508_p3 = pnand %p2507_p2, %p2501_p13 }
  0x7f   : > { %536 = vperm.xlu1 %2457, %v317_v14   ;;  %408 = vperm.xlu0 %2456, %v313_v15  }
  0x83   : > { %566 = vperm.xlu1 %2457, %v322_v16   ;;  %541 = vperm.xlu0 %2456, %v318_v17  }
  0x87   : > { %413 = vperm.xlu1 %2457, %v314_v18   ;;  %571 = vperm.xlu0 %2456, %v323_v19  }
  0x89   : > { %v376_v22 = vpop.permute.xlu1 %375  ;;  %v388_v23 = vpop.permute.xlu0 %387 }
  0x8a   : > { %2171 = vmatpush3.msk.msra.mxu0 %vm389_vm2, %v388_v23 }
  0x8b   : > { %2172 = vmatprep.subr.mxu0 %v2560_v0  ;;  %546 = vperm.xlu1 %2457, %v319_v21  }
  0x8c   : > { %418 = vperm.xlu0 %2456, %v315_v24  }
  0x8d   : > { %v370_v28 = vpop.permute.xlu1 %369  ;;  %v382_v29 = vpop.permute.xlu0 %381 }
  0x8f   : > { %576 = vperm.xlu1 %2457, %v324_v27  }
  0x90   : > { %551 = vperm.xlu0 %2456, %v320_v30  }
  0x91   : > { %v379_v32 = vpop.permute.xlu0 %378  ;;  %v385_v33 = vpop.permute.xlu1 %384 }
  0x92   : > { %v395_v34 = vsel %vm389_vm2, %v382_v29, %v385_v33  ;;  %v394_v35 = vsel %vm389_vm2, %v376_v22, %v379_v32 }
  0x93   : > { %2173 = vmatpush3.msra.mxu0 %v395_v34  ;;  %581 = vperm.xlu1 %2457, %v325_v31  }
  0x94   : > { %2174 = vmatprep.subr.mxu0 %v2560_v0 }
  0x95   : > { %v373_v36 = vpop.permute.xlu0 %372  ;;  %2175 = vmatpush3.msra.mxu0 %v394_v35  ;;  %v364_v37 = vpop.permute.xlu1 %363 }
  0x96   : > { %2176 = vmatprep.subr.mxu0 %v2560_v0  ;;  %v393_v38 = vsel %vm389_vm2, %v370_v28, %v373_v36 }
  0x97   : > { %2177 = vmatpush3.msra.mxu0 %v393_v38 }
  0x98   : > { %2178 = vmatprep.subr.mxu0 %v2560_v0 }
  0x99   : > { %v367_v39 = vpop.permute.xlu0 %366  ;;  %v358_v40 = vpop.permute.xlu1 %357 }
  0x9a   : > { %v392_v41 = vsel %vm389_vm2, %v364_v37, %v367_v39 }
  0x9b   : > { %2179 = vmatpush3.msra.mxu0 %v392_v41 }
  0x9c   : > { %2180 = vmatprep.subr.mxu0 %v2560_v0 }
  0x9d   : > { %v361_v42 = vpop.permute.xlu0 %360  ;;  %v355_v43 = vpop.permute.xlu1 %354 }
  0x9e   : > { %v391_v44 = vsel %vm389_vm2, %v358_v40, %v361_v42  ;;  %v390_v45 = vsel %vm389_vm2, %v2678_v1, %v355_v43  ;;  %v2978_v42 = vld [vmem:[%s3483_s5 + $0x18] sm:$0xff] }
  0x9f   : > { %2181 = vmatpush3.msra.mxu0 %v391_v44  ;;  %2206 = vmatpush3.msra.mxu1 %v2978_v42 }
  0xa0   : > { %2182 = vmatprep.subr.mxu0 %v2560_v0  ;;  %2207 = vmatprep.subr.mxu1 %v2560_v0 }
  0xa1   : > { %v854_v47 = vpop.permute.xlu0 %853  ;;  %2183 = vmatpush3.msra.mxu0 %v390_v45  ;;  %v848_v48 = vpop.permute.xlu1 %847  ;;  %v2986_v45 = vld [vmem:[%s3483_s5 + $0x10] sm:$0xff] }
  0xa2   : > { %2185 = vmatmul.mubr.msk.f32.vlgmr.msra.gmra.mxu0 %vm421_vm3, %v2852_v46  ;;  %2228 = vmatprep.subr.mxu0 %v2560_v0 }
  0xa3   : > { %2187 = vmatprep.mubr.msk.f32.mxu0 %vm2567_vm0, %v2560_v0  ;;  %2229 = vmatpush3.msk.msra.mxu0 %vm389_vm2, %v854_v47 }
  0xa4   : > { %2230 = vmatprep.subr.mxu0 %v2560_v0  ;;  %2208 = vmatpush3.msra.mxu1 %v2986_v45 }
  0xa5   : > { %v851_v50 = vpop.permute.xlu0 %850  ;;  %v842_v51 = vpop.permute.xlu1 %841  ;;  %2209 = vmatprep.subr.mxu1 %v2560_v0 }
  0xa6   : > { %v860_v52 = vsel %vm389_vm2, %v848_v48, %v851_v50  ;;  %2188 = vmatmul.mubr.msk.f32.gmra.mxu0 %vm421_vm3, %v2863_v49  ;;  %v2996_v50 = vld [vmem:[%s3483_s5 + $0x8] sm:$0xff] }
  0xa7   : > { %2190 = vmatprep.mubr.msk.f32.mxu0 %vm2567_vm0, %v2560_v0  ;;  %2231 = vmatpush3.msra.mxu0 %v860_v52 }
  0xa8   : > { %2232 = vmatprep.subr.mxu0 %v2560_v0  ;;  %2210 = vmatpush3.msra.mxu1 %v2996_v50 }
  0xa9   : > { %v845_v54 = vpop.permute.xlu0 %844  ;;  %v836_v55 = vpop.permute.xlu1 %835  ;;  %2211 = vmatprep.subr.mxu1 %v2560_v0 }
  0xaa   : > { %v859_v56 = vsel %vm389_vm2, %v842_v51, %v845_v54  ;;  %2191 = vmatmul.mubr.msk.f32.gmra.mxu0 %vm421_vm3, %v2875_v53 }
  0xab   : > { %2193 = vmatprep.mubr.msk.f32.mxu0 %vm2567_vm0, %v2560_v0  ;;  %2233 = vmatpush3.msra.mxu0 %v859_v56 }
  0xac   : > { %2234 = vmatprep.subr.mxu0 %v2560_v0 }
  0xad   : > { %v839_v58 = vpop.permute.xlu0 %838  ;;  %v830_v59 = vpop.permute.xlu1 %829 }
  0xae   : > { %v858_v60 = vsel %vm389_vm2, %v836_v55, %v839_v58  ;;  %2194 = vmatmul.mubr.msk.f32.gmra.mxu0 %vm421_vm3, %v2886_v57 }
  0xaf   : > { %2196 = vmatprep.mubr.msk.f32.mxu0 %vm2567_vm0, %v2560_v0  ;;  %2235 = vmatpush3.msra.mxu0 %v858_v60 }
  0xb0   : > { %2236 = vmatprep.subr.mxu0 %v2560_v0 }
  0xb1   : > { %v833_v62 = vpop.permute.xlu0 %832  ;;  %v824_v63 = vpop.permute.xlu1 %823 }
  0xb2   : > { %v857_v1 = vsel %vm389_vm2, %v830_v59, %v833_v62  ;;  %2197 = vmatmul.mubr.msk.f32.gmra.mxu0 %vm421_vm3, %v2897_v61 }
  0xb3   : > { %2237 = vmatpush3.msra.mxu0 %v857_v1  ;;  %2242 = vmatprep.mubr.msk.f32.mxu0 %vm2567_vm0, %v2560_v0 }
  0xb4   : > { %2238 = vmatprep.subr.mxu0 %v2560_v0 }
  0xb5   : > { %v827_v2 = vpop.permute.xlu0 %826  ;;  %v821_v4 = vpop.permute.xlu1 %820 }
  0xb6   : > { %v856_v6 = vsel %vm389_vm2, %v824_v63, %v827_v2  ;;  %v855_v7 = vsel %vm389_vm2, %v2704_v3, %v821_v4 }
  0xb7   : > { %2239 = vmatpush3.msra.mxu0 %v856_v6 }
  0xb8   : > { %2240 = vmatprep.subr.mxu0 %v2560_v0 }
  0xb9   : > { %v1220_v9 = vpop.permute.xlu0 %1219  ;;  %2241 = vmatpush3.msra.mxu0 %v855_v7  ;;  %v1214_v10 = vpop.permute.xlu1 %1213 }
  0xba   : > { %2243 = vmatmul.mubr.msk.f32.vlgmr.msra.gmra.mxu0 %vm421_vm3, %v2852_v46  ;;  %2286 = vmatprep.subr.mxu0 %v2560_v0 }
  0xbb   : > { %2245 = vmatprep.mubr.msk.f32.mxu0 %vm2567_vm0, %v2560_v0  ;;  %2287 = vmatpush3.msk.msra.mxu0 %vm389_vm2, %v1220_v9 }
  0xbc   : > { %2288 = vmatprep.subr.mxu0 %v2560_v0 }
  0xbd   : > { %v1217_v11 = vpop.permute.xlu0 %1216  ;;  %v1208_v3 = vpop.permute.xlu1 %1207 }
  0xbe   : > { %v1226_v12 = vsel %vm389_vm2, %v1214_v10, %v1217_v11  ;;  %2246 = vmatmul.mubr.msk.f32.gmra.mxu0 %vm421_vm3, %v2863_v49 }
  0xbf   : > { %2248 = vmatprep.mubr.msk.f32.mxu0 %vm2567_vm0, %v2560_v0  ;;  %2289 = vmatpush3.msra.mxu0 %v1226_v12 }
  0xc0   : > { %2290 = vmatprep.subr.mxu0 %v2560_v0 }
  0xc1   : > { %v1211_v13 = vpop.permute.xlu0 %1210  ;;  %v1202_v14 = vpop.permute.xlu1 %1201 }
  0xc2   : > { %v1225_v15 = vsel %vm389_vm2, %v1208_v3, %v1211_v13  ;;  %2249 = vmatmul.mubr.msk.f32.gmra.mxu0 %vm421_vm3, %v2875_v53 }
  0xc3   : > { %2251 = vmatprep.mubr.msk.f32.mxu0 %vm2567_vm0, %v2560_v0  ;;  %2291 = vmatpush3.msra.mxu0 %v1225_v15 }
  0xc4   : > { %2292 = vmatprep.subr.mxu0 %v2560_v0 }
  0xc5   : > { %v1205_v16 = vpop.permute.xlu0 %1204  ;;  %v1196_v17 = vpop.permute.xlu1 %1195 }
  0xc6   : > { %v1224_v18 = vsel %vm389_vm2, %v1202_v14, %v1205_v16  ;;  %2252 = vmatmul.mubr.msk.f32.gmra.mxu0 %vm421_vm3, %v2886_v57 }
  0xc7   : > { %2254 = vmatprep.mubr.msk.f32.mxu0 %vm2567_vm0, %v2560_v0  ;;  %2293 = vmatpush3.msra.mxu0 %v1224_v18 }
  0xc8   : > { %2294 = vmatprep.subr.mxu0 %v2560_v0 }
  0xc9   : > { %v1199_v19 = vpop.permute.xlu0 %1198  ;;  %v1190_v21 = vpop.permute.xlu1 %1189 }
  0xca   : > { %v1223_v22 = vsel %vm389_vm2, %v1196_v17, %v1199_v19  ;;  %2255 = vmatmul.mubr.msk.f32.gmra.mxu0 %vm421_vm3, %v2897_v61 }
  0xcb   : > { %2295 = vmatpush3.msra.mxu0 %v1223_v22  ;;  %2300 = vmatprep.mubr.msk.f32.mxu0 %vm2567_vm0, %v2560_v0 }
  0xcc   : > { %2296 = vmatprep.subr.mxu0 %v2560_v0 }
  0xcd   : > { %v1193_v23 = vpop.permute.xlu0 %1192  ;;  %v1187_v24 = vpop.permute.xlu1 %1186 }
  0xce   : > { %v1222_v27 = vsel %vm389_vm2, %v1190_v21, %v1193_v23  ;;  %v1221_v28 = vsel %vm389_vm2, %v2726_v5, %v1187_v24 }
  0xcf   : > { %2297 = vmatpush3.msra.mxu0 %v1222_v27 }
  0xd0   : > { %2298 = vmatprep.subr.mxu0 %v2560_v0 }
  0xd1   : > { %v1586_v29 = vpop.permute.xlu0 %1585  ;;  %2299 = vmatpush3.msra.mxu0 %v1221_v28  ;;  %v1580_v30 = vpop.permute.xlu1 %1579 }
  0xd2   : > { %2301 = vmatmul.mubr.msk.f32.vlgmr.msra.gmra.mxu0 %vm421_vm3, %v2852_v46  ;;  %2344 = vmatprep.subr.mxu0 %v2560_v0 }
  0xd3   : > { %2303 = vmatprep.mubr.msk.f32.mxu0 %vm2567_vm0, %v2560_v0  ;;  %2345 = vmatpush3.msk.msra.mxu0 %vm389_vm2, %v1586_v29 }
  0xd4   : > { %2346 = vmatprep.subr.mxu0 %v2560_v0 }
  0xd5   : > { %v1583_v31 = vpop.permute.xlu0 %1582  ;;  %v1574_v5 = vpop.permute.xlu1 %1573 }
  0xd6   : > { %v1592_v32 = vsel %vm389_vm2, %v1580_v30, %v1583_v31  ;;  %2304 = vmatmul.mubr.msk.f32.gmra.mxu0 %vm421_vm3, %v2863_v49 }
  0xd7   : > { %2306 = vmatprep.mubr.msk.f32.mxu0 %vm2567_vm0, %v2560_v0  ;;  %2347 = vmatpush3.msra.mxu0 %v1592_v32 }
  0xd8   : > { %2348 = vmatprep.subr.mxu0 %v2560_v0 }
  0xd9   : > { %v1577_v33 = vpop.permute.xlu0 %1576  ;;  %v1568_v34 = vpop.permute.xlu1 %1567 }
  0xda   : > { %v1591_v35 = vsel %vm389_vm2, %v1574_v5, %v1577_v33  ;;  %2307 = vmatmul.mubr.msk.f32.gmra.mxu0 %vm421_vm3, %v2875_v53 }
  0xdb   : > { %2309 = vmatprep.mubr.msk.f32.mxu0 %vm2567_vm0, %v2560_v0  ;;  %2349 = vmatpush3.msra.mxu0 %v1591_v35 }
  0xdc   : > { %2350 = vmatprep.subr.mxu0 %v2560_v0 }
  0xdd   : > { %v1571_v36 = vpop.permute.xlu0 %1570  ;;  %v1562_v37 = vpop.permute.xlu1 %1561 }
  0xde   : > { %v1590_v38 = vsel %vm389_vm2, %v1568_v34, %v1571_v36  ;;  %2310 = vmatmul.mubr.msk.f32.gmra.mxu0 %vm421_vm3, %v2886_v57 }
  0xdf   : > { %2312 = vmatprep.mubr.msk.f32.mxu0 %vm2567_vm0, %v2560_v0  ;;  %2351 = vmatpush3.msra.mxu0 %v1590_v38 }
  0xe0   : > { %2352 = vmatprep.subr.mxu0 %v2560_v0 }
  0xe1   : > { %v1565_v39 = vpop.permute.xlu0 %1564  ;;  %v1556_v40 = vpop.permute.xlu1 %1555 }
  0xe2   : > { %v1589_v41 = vsel %vm389_vm2, %v1562_v37, %v1565_v39  ;;  %2313 = vmatmul.mubr.msk.f32.gmra.mxu0 %vm421_vm3, %v2897_v61 }
  0xe3   : > { %2353 = vmatpush3.msra.mxu0 %v1589_v41  ;;  %2358 = vmatprep.mubr.msk.f32.mxu0 %vm2567_vm0, %v2560_v0 }
  0xe4   : > { %2354 = vmatprep.subr.mxu0 %v2560_v0 }
  0xe5   : > { %v1559_v43 = vpop.permute.xlu0 %1558  ;;  %v1553_v44 = vpop.permute.xlu1 %1552 }
  0xe6   : > { %v1588_v47 = vsel %vm389_vm2, %v1556_v40, %v1559_v43  ;;  %v1587_v48 = vsel %vm389_vm2, %v2748_v8, %v1553_v44  ;;  %v3004_v8 = vld [vmem:[%s3483_s5] sm:$0xff] }
  0xe7   : > { %2355 = vmatpush3.msra.mxu0 %v1588_v47  ;;  %2212 = vmatpush3.msra.mxu1 %v3004_v8 }
  0xe8   : > { %2356 = vmatprep.subr.mxu0 %v2560_v0  ;;  %2257 = vmatprep.subr.mxu1 %v2560_v0 }
  0xe9   : > { %2357 = vmatpush3.msra.mxu0 %v1587_v48 }
  0xea   : > { %2359 = vmatmul.mubr.msk.f32.vlgmr.msra.gmra.mxu0 %vm421_vm3, %v2852_v46 }
  0xeb   : > { %2361 = vmatprep.mubr.msk.f32.mxu0 %vm2567_vm0, %v2560_v0 }
  0xee   : > { %2362 = vmatmul.mubr.msk.f32.gmra.mxu0 %vm421_vm3, %v2863_v49 }
  0xef   : > { %2364 = vmatprep.mubr.msk.f32.mxu0 %vm2567_vm0, %v2560_v0 }
  0xf2   : > { %2365 = vmatmul.mubr.msk.f32.gmra.mxu0 %vm421_vm3, %v2875_v53  ;;  %v3026_v46 = vpop.permute.xlu1 %531  ;;  %v3028_v49 = vpop.permute.xlu0 %398 }
  0xf3   : > { %2367 = vmatprep.mubr.msk.f32.mxu0 %vm2567_vm0, %v2560_v0 }
  0xf6   : > { %2368 = vmatmul.mubr.msk.f32.gmra.mxu0 %vm421_vm3, %v2886_v57  ;;  %v3030_v51 = vpop.permute.xlu1 %403  ;;  %v3032_v52 = vpop.permute.xlu0 %561 }
  0xf7   : > { %2370 = vmatprep.mubr.msk.f32.mxu0 %vm2567_vm0, %v2560_v0 }
  0xfa   : > { %2371 = vmatmul.mubr.msk.f32.gmra.mxu0 %vm421_vm3, %v2897_v61  ;;  %v3034_v53 = vpop.permute.xlu1 %536  ;;  %v3036_v54 = vpop.permute.xlu0 %408 }
  0xfe   : > { %v3038_v55 = vpop.permute.xlu1 %566  ;;  %v3040_v56 = vpop.permute.xlu0 %541 }
 0x102   : > { %v3043_v59 = vpop.permute.xlu1 %413  ;;  %v3048_v2 = vpop.permute.xlu0 %571 }
 0x106   : > { %v3051_v9 = vpop.permute.xlu1 %546 }
 0x107   : > { %v3062_v15 = vpop.permute.xlu0 %418 }
 0x10a   : > { %v3069_v19 = vpop.permute.xlu1 %576 }
 0x10b   : > { %v3081_v29 = vpop.permute.xlu0 %551 }
 0x10e   : > { %v3088_v32 = vpop.permute.xlu1 %581 }
 0x162   : > { %v505_v57 = vpop.f32.mrf.mxu0 }
 0x163   : > { %v506_v58 = vadd.f32 %v505_v57, %v3028_v49 }
 0x164   : > { %v2186_v60 = vpop.f32.mrf.mxu0 }
 0x165   : > { %v554_v61 = vmul.f32 %v3026_v46, %v506_v58 }
 0x166   : > { %v510_v62 = vpop.f32.mrf.mxu0 }
 0x167   : > { %v584_v63 = vadd.f32 %v3032_v52, %v554_v61  ;;  %v511_v1 = vadd.f32 %v510_v62, %v3030_v51 }
 0x168   : > { %v2189_v4 = vpop.f32.mrf.mxu0 }
 0x169   : > { %v589_v6 = vmul.f32 %v584_v63, %v584_v63  ;;  %v555_v7 = vmul.f32 %v3034_v53, %v511_v1 }
 0x16a   : > { %v515_v10 = vpop.f32.mrf.mxu0 }
 0x16b   : > { %v585_v11 = vadd.f32 %v3038_v55, %v555_v7  ;;  %v516_v3 = vadd.f32 %v515_v10, %v3036_v54  ;;  %2214 = vmatmul.mubr.msk.f32.vlgmr.msra.gmra.mxu1 %vm594_vm4, %v589_v6 }
 0x16c   : > { %v2192_v12 = vpop.f32.mrf.mxu0  ;;  %2216 = vmatprep.mubr.msk.f32.mxu1 %vm2567_vm0, %v2560_v0  ;;  %2258 = vmatpush3.msk.msra.mxu1 %vm610_vm1, %v2802_v20 }
 0x16d   : > { %v590_v13 = vmul.f32 %v585_v11, %v585_v11  ;;  %v556_v14 = vmul.f32 %v3040_v56, %v516_v3  ;;  %2259 = vmatprep.subr.mxu1 %v2560_v0 }
 0x16e   : > { %v520_v16 = vpop.f32.mrf.mxu0  ;;  %2260 = vmatpush3.msra.mxu1 %v2817_v25 }
 0x16f   : > { %v586_v17 = vadd.f32 %v3048_v2, %v556_v14  ;;  %v521_v18 = vadd.f32 %v520_v16, %v3043_v59  ;;  %2217 = vmatmul.mubr.msk.f32.gmra.mxu1 %vm594_vm4, %v590_v13  ;;  %2261 = vmatprep.subr.mxu1 %v2560_v0 }
 0x170   : > { %v2195_v21 = vpop.f32.mrf.mxu0  ;;  %2219 = vmatprep.mubr.msk.f32.mxu1 %vm2567_vm0, %v2560_v0  ;;  %2262 = vmatpush3.msra.mxu1 %v2823_v26 }
 0x171   : > { %v591_v22 = vmul.f32 %v586_v17, %v586_v17  ;;  %v557_v23 = vmul.f32 %v3051_v9, %v521_v18  ;;  %2263 = vmatprep.subr.mxu1 %v2560_v0 }
 0x172   : > { %v525_v24 = vpop.f32.mrf.mxu0  ;;  %2264 = vmatpush3.msra.mxu1 %v2978_v42 }
 0x173   : > { %v587_v27 = vadd.f32 %v3069_v19, %v557_v23  ;;  %v526_v28 = vadd.f32 %v525_v24, %v3062_v15  ;;  %2220 = vmatmul.mubr.msk.f32.gmra.mxu1 %vm594_vm4, %v591_v22  ;;  %2265 = vmatprep.subr.mxu1 %v2560_v0 }
 0x174   : > { %2222 = vmatprep.mubr.msk.f32.mxu1 %vm2567_vm0, %v2560_v0  ;;  %v2198_v30 = vpop.f32.mrf.mxu0  ;;  %2266 = vmatpush3.msra.mxu1 %v2986_v45 }
 0x175   : > { %v592_v31 = vmul.f32 %v587_v27, %v587_v27  ;;  %v558_v5 = vmul.f32 %v3081_v29, %v526_v28  ;;  %2267 = vmatprep.subr.mxu1 %v2560_v0 }
 0x176   : > { %2268 = vmatpush3.msra.mxu1 %v2996_v50 }
 0x177   : > { %v588_v33 = vadd.f32 %v3088_v32, %v558_v5  ;;  %2223 = vmatmul.mubr.msk.f32.gmra.mxu1 %vm594_vm4, %v592_v31  ;;  %2269 = vmatprep.subr.mxu1 %v2560_v0 }
 0x178   : > { %2225 = vmatprep.mubr.msk.f32.mxu1 %vm2567_vm0, %v2560_v0  ;;  %2270 = vmatpush3.msra.mxu1 %v3004_v8 }
 0x179   : > { %v593_v34 = vmul.f32 %v588_v33, %v588_v33  ;;  %2315 = vmatprep.subr.mxu1 %v2560_v0 }
 0x17a   : > { %v929_v35 = vpop.f32.mrf.mxu0 }
 0x17b   : > { %v930_v36 = vadd.f32 %v929_v35, %v3028_v49  ;;  %2226 = vmatmul.mubr.msk.f32.gmra.mxu1 %vm594_vm4, %v593_v34 }
 0x17c   : > { %v2244_v37 = vpop.f32.mrf.mxu0  ;;  %2271 = vmatprep.mubr.msk.f32.mxu1 %vm2567_vm0, %v2560_v0 }
 0x17d   : > { %v953_v38 = vmul.f32 %v930_v36, %v3026_v46 }
 0x17e   : > { %v934_v39 = vpop.f32.mrf.mxu0 }
 0x17f   : > { %v958_v40 = vadd.f32 %v953_v38, %v3032_v52  ;;  %v935_v41 = vadd.f32 %v934_v39, %v3030_v51 }
 0x180   : > { %v2247_v43 = vpop.f32.mrf.mxu0 }
 0x181   : > { %v963_v44 = vmul.f32 %v958_v40, %v958_v40  ;;  %v954_v47 = vmul.f32 %v935_v41, %v3034_v53 }
 0x182   : > { %v939_v48 = vpop.f32.mrf.mxu0 }
 0x183   : > { %v959_v57 = vadd.f32 %v954_v47, %v3038_v55  ;;  %v940_v58 = vadd.f32 %v939_v48, %v3036_v54  ;;  %2272 = vmatmul.mubr.msk.f32.vlgmr.msra.gmra.mxu1 %vm594_vm4, %v963_v44 }
 0x184   : > { %v2250_v60 = vpop.f32.mrf.mxu0  ;;  %2274 = vmatprep.mubr.msk.f32.mxu1 %vm2567_vm0, %v2560_v0  ;;  %2316 = vmatpush3.msk.msra.mxu1 %vm610_vm1, %v2802_v20 }
 0x185   : > { %v964_v61 = vmul.f32 %v959_v57, %v959_v57  ;;  %v955_v62 = vmul.f32 %v940_v58, %v3040_v56  ;;  %2317 = vmatprep.subr.mxu1 %v2560_v0 }
 0x186   : > { %v944_v63 = vpop.f32.mrf.mxu0  ;;  %2318 = vmatpush3.msra.mxu1 %v2817_v25 }
 0x187   : > { %v960_v1 = vadd.f32 %v955_v62, %v3048_v2  ;;  %v945_v4 = vadd.f32 %v944_v63, %v3043_v59  ;;  %2275 = vmatmul.mubr.msk.f32.gmra.mxu1 %vm594_vm4, %v964_v61  ;;  %2319 = vmatprep.subr.mxu1 %v2560_v0 }
 0x188   : > { %v2253_v6 = vpop.f32.mrf.mxu0  ;;  %2277 = vmatprep.mubr.msk.f32.mxu1 %vm2567_vm0, %v2560_v0  ;;  %2320 = vmatpush3.msra.mxu1 %v2823_v26 }
 0x189   : > { %v965_v7 = vmul.f32 %v960_v1, %v960_v1  ;;  %v956_v10 = vmul.f32 %v945_v4, %v3051_v9  ;;  %2321 = vmatprep.subr.mxu1 %v2560_v0 }
 0x18a   : > { %v949_v11 = vpop.f32.mrf.mxu0  ;;  %2322 = vmatpush3.msra.mxu1 %v2978_v42 }
 0x18b   : > { %v961_v3 = vadd.f32 %v956_v10, %v3069_v19  ;;  %v950_v12 = vadd.f32 %v949_v11, %v3062_v15  ;;  %2278 = vmatmul.mubr.msk.f32.gmra.mxu1 %vm594_vm4, %v965_v7  ;;  %2323 = vmatprep.subr.mxu1 %v2560_v0 }
 0x18c   : > { %2280 = vmatprep.mubr.msk.f32.mxu1 %vm2567_vm0, %v2560_v0  ;;  %v2256_v13 = vpop.f32.mrf.mxu0  ;;  %2324 = vmatpush3.msra.mxu1 %v2986_v45 }
 0x18d   : > { %v966_v14 = vmul.f32 %v961_v3, %v961_v3  ;;  %v957_v16 = vmul.f32 %v950_v12, %v3081_v29  ;;  %2325 = vmatprep.subr.mxu1 %v2560_v0 }
 0x18e   : > { %2326 = vmatpush3.msra.mxu1 %v2996_v50 }
 0x18f   : > { %v962_v17 = vadd.f32 %v957_v16, %v3088_v32  ;;  %2281 = vmatmul.mubr.msk.f32.gmra.mxu1 %vm594_vm4, %v966_v14  ;;  %2327 = vmatprep.subr.mxu1 %v2560_v0 }
 0x190   : > { %2283 = vmatprep.mubr.msk.f32.mxu1 %vm2567_vm0, %v2560_v0  ;;  %2328 = vmatpush3.msra.mxu1 %v3004_v8 }
 0x191   : > { %v967_v18 = vmul.f32 %v962_v17, %v962_v17  ;;  %2373 = vmatprep.subr.mxu1 %v2560_v0 }
 0x192   : > { %v1295_v21 = vpop.f32.mrf.mxu0 }
 0x193   : > { %v1296_v22 = vadd.f32 %v1295_v21, %v3028_v49  ;;  %2284 = vmatmul.mubr.msk.f32.gmra.mxu1 %vm594_vm4, %v967_v18 }
 0x194   : > { %v2302_v23 = vpop.f32.mrf.mxu0  ;;  %2329 = vmatprep.mubr.msk.f32.mxu1 %vm2567_vm0, %v2560_v0 }
 0x195   : > { %v1319_v24 = vmul.f32 %v1296_v22, %v3026_v46 }
 0x196   : > { %v1300_v27 = vpop.f32.mrf.mxu0 }
 0x197   : > { %v1324_v28 = vadd.f32 %v1319_v24, %v3032_v52  ;;  %v1301_v30 = vadd.f32 %v1300_v27, %v3030_v51 }
 0x198   : > { %v2305_v31 = vpop.f32.mrf.mxu0 }
 0x199   : > { %v1329_v5 = vmul.f32 %v1324_v28, %v1324_v28  ;;  %v1320_v33 = vmul.f32 %v1301_v30, %v3034_v53 }
 0x19a   : > { %v1305_v34 = vpop.f32.mrf.mxu0 }
 0x19b   : > { %v1325_v35 = vadd.f32 %v1320_v33, %v3038_v55  ;;  %v1306_v36 = vadd.f32 %v1305_v34, %v3036_v54  ;;  %2330 = vmatmul.mubr.msk.f32.vlgmr.msra.gmra.mxu1 %vm594_vm4, %v1329_v5  ;;  %v3221_v34 = vld [vmem:[%s3484_s6 + $0x50] sm:$0xff] }
 0x19c   : > { %v2308_v37 = vpop.f32.mrf.mxu0  ;;  %2332 = vmatprep.mubr.msk.f32.mxu1 %vm2567_vm0, %v2560_v0  ;;  %2374 = vmatpush3.msk.msra.mxu1 %vm610_vm1, %v2802_v20 }
 0x19d   : > { %v1330_v38 = vmul.f32 %v1325_v35, %v1325_v35  ;;  %v1321_v39 = vmul.f32 %v1306_v36, %v3040_v56  ;;  %2375 = vmatprep.subr.mxu1 %v2560_v0  ;;  %v3226_v35 = vld [vmem:[%s3484_s6] sm:$0xff] }
 0x19e   : > { %v1310_v40 = vpop.f32.mrf.mxu0  ;;  %2376 = vmatpush3.msra.mxu1 %v2817_v25 }
 0x19f   : > { %v1326_v41 = vadd.f32 %v1321_v39, %v3048_v2  ;;  %v1311_v43 = vadd.f32 %v1310_v40, %v3043_v59  ;;  %2333 = vmatmul.mubr.msk.f32.gmra.mxu1 %vm594_vm4, %v1330_v38  ;;  %2377 = vmatprep.subr.mxu1 %v2560_v0  ;;  %v3231_v38 = vld [vmem:[%s3484_s6 + $0x28] sm:$0xff] }
 0x1a0   : > { %v2311_v44 = vpop.f32.mrf.mxu0  ;;  %2335 = vmatprep.mubr.msk.f32.mxu1 %vm2567_vm0, %v2560_v0  ;;  %2378 = vmatpush3.msra.mxu1 %v2823_v26 }
 0x1a1   : > { %v1331_v20 = vmul.f32 %v1326_v41, %v1326_v41  ;;  %v1322_v47 = vmul.f32 %v1311_v43, %v3051_v9  ;;  %2379 = vmatprep.subr.mxu1 %v2560_v0 }
 0x1a2   : > { %v1315_v25 = vpop.f32.mrf.mxu0  ;;  %2380 = vmatpush3.msra.mxu1 %v2978_v42 }
 0x1a3   : > { %v1327_v48 = vadd.f32 %v1322_v47, %v3069_v19  ;;  %v1316_v57 = vadd.f32 %v1315_v25, %v3062_v15  ;;  %2336 = vmatmul.mubr.msk.f32.gmra.mxu1 %vm594_vm4, %v1331_v20  ;;  %2381 = vmatprep.subr.mxu1 %v2560_v0  ;;  %v3239_v20 = vld [vmem:[%s3484_s6 + $0x8] sm:$0xff] }
 0x1a4   : > { %2338 = vmatprep.mubr.msk.f32.mxu1 %vm2567_vm0, %v2560_v0  ;;  %v2314_v26 = vpop.f32.mrf.mxu0  ;;  %2382 = vmatpush3.msra.mxu1 %v2986_v45 }
 0x1a5   : > { %v1332_v58 = vmul.f32 %v1327_v48, %v1327_v48  ;;  %v1323_v60 = vmul.f32 %v1316_v57, %v3081_v29  ;;  %2383 = vmatprep.subr.mxu1 %v2560_v0  ;;  %v3246_v57 = vld [vmem:[%s3484_s6 + $0x58] sm:$0xff]  ;;  %v3251_v26 = vld [vmem:[%s3484_s6 + $0x30] sm:$0xff] }
 0x1a6   : > { %2384 = vmatpush3.msra.mxu1 %v2996_v50 }
 0x1a7   : > { %v1328_v42 = vadd.f32 %v1323_v60, %v3088_v32  ;;  %2339 = vmatmul.mubr.msk.f32.gmra.mxu1 %vm594_vm4, %v1332_v58  ;;  %2385 = vmatprep.subr.mxu1 %v2560_v0 }
 0x1a8   : > { %2341 = vmatprep.mubr.msk.f32.mxu1 %vm2567_vm0, %v2560_v0  ;;  %2386 = vmatpush3.msra.mxu1 %v3004_v8 }
 0x1a9   : > { %v1333_v61 = vmul.f32 %v1328_v42, %v1328_v42 }
 0x1aa   : > { %v1661_v45 = vpop.f32.mrf.mxu0 }
 0x1ab   : > { %v1662_v62 = vadd.f32 %v1661_v45, %v3028_v49  ;;  %2342 = vmatmul.mubr.msk.f32.gmra.mxu1 %vm594_vm4, %v1333_v61 }
 0x1ac   : > { %v2360_v63 = vpop.f32.mrf.mxu0  ;;  %2387 = vmatprep.mubr.msk.f32.mxu1 %vm2567_vm0, %v2560_v0 }
 0x1ad   : > { %v1685_v50 = vmul.f32 %v1662_v62, %v3026_v46 }
 0x1ae   : > { %v1666_v1 = vpop.f32.mrf.mxu0 }
 0x1af   : > { %v1690_v4 = vadd.f32 %v1685_v50, %v3032_v52  ;;  %v1667_v6 = vadd.f32 %v1666_v1, %v3030_v51 }
 0x1b0   : > { %v2363_v7 = vpop.f32.mrf.mxu0 }
 0x1b1   : > { %v1695_v10 = vmul.f32 %v1690_v4, %v1690_v4  ;;  %v1686_v8 = vmul.f32 %v1667_v6, %v3034_v53  ;;  %v3261_v4 = vld [vmem:[%s3484_s6 + $0x60] sm:$0xff]  ;;  %v3266_v7 = vld [vmem:[%s3484_s6 + $0x10] sm:$0xff] }
 0x1b2   : > { %v1671_v11 = vpop.f32.mrf.mxu0 }
 0x1b3   : > { %v1691_v49 = vadd.f32 %v1686_v8, %v3038_v55  ;;  %v1672_v3 = vadd.f32 %v1671_v11, %v3036_v54  ;;  %2388 = vmatmul.mubr.msk.f32.vlgmr.msra.gmra.mxu1 %vm594_vm4, %v1695_v10 }
 0x1b4   : > { %v2366_v12 = vpop.f32.mrf.mxu0  ;;  %2390 = vmatprep.mubr.msk.f32.mxu1 %vm2567_vm0, %v2560_v0 }
 0x1b5   : > { %v1696_v46 = vmul.f32 %v1691_v49, %v1691_v49  ;;  %v1687_v52 = vmul.f32 %v1672_v3, %v3040_v56 }
 0x1b6   : > { %v1676_v13 = vpop.f32.mrf.mxu0 }
 0x1b7   : > { %v1692_v51 = vadd.f32 %v1687_v52, %v3048_v2  ;;  %v1677_v14 = vadd.f32 %v1676_v13, %v3043_v59  ;;  %2391 = vmatmul.mubr.msk.f32.gmra.mxu1 %vm594_vm4, %v1696_v46  ;;  %v3275_v13 = vld [vmem:[%s3484_s6 + $0x38] sm:$0xff] }
 0x1b8   : > { %v2369_v53 = vpop.f32.mrf.mxu0  ;;  %2393 = vmatprep.mubr.msk.f32.mxu1 %vm2567_vm0, %v2560_v0 }
 0x1b9   : > { %v1697_v54 = vmul.f32 %v1692_v51, %v1692_v51  ;;  %v1688_v55 = vmul.f32 %v1677_v14, %v3051_v9  ;;  %v3280_v14 = vld [vmem:[%s3484_s6 + $0x40] sm:$0xff] }
 0x1ba   : > { %v1681_v16 = vpop.f32.mrf.mxu0 }
 0x1bb   : > { %v1693_v17 = vadd.f32 %v1688_v55, %v3069_v19  ;;  %v1682_v18 = vadd.f32 %v1681_v16, %v3062_v15  ;;  %2394 = vmatmul.mubr.msk.f32.gmra.mxu1 %vm594_vm4, %v1697_v54 }
 0x1bc   : > { %2396 = vmatprep.mubr.msk.f32.mxu1 %vm2567_vm0, %v2560_v0  ;;  %v2372_v56 = vpop.f32.mrf.mxu0 }
 0x1bd   : > { %v1698_v59 = vmul.f32 %v1693_v17, %v1693_v17  ;;  %v1689_v2 = vmul.f32 %v1682_v18, %v3081_v29 }
 0x1bf   : > { %v1694_v21 = vadd.f32 %v1689_v2, %v3088_v32  ;;  %2397 = vmatmul.mubr.msk.f32.gmra.mxu1 %vm594_vm4, %v1698_v59  ;;  %v3289_v2 = vld [vmem:[%s3484_s6 + $0x18] sm:$0xff] }
 0x1c0   : > { %2399 = vmatprep.mubr.msk.f32.mxu1 %vm2567_vm0, %v2560_v0 }
 0x1c1   : > { %v1699_v9 = vmul.f32 %v1694_v21, %v1694_v21 }
 0x1c3   : > { %2400 = vmatmul.mubr.msk.f32.gmra.mxu1 %vm594_vm4, %v1699_v9  ;;  %v3294_v9 = vld [vmem:[%s3484_s6 + $0x20] sm:$0xff] }
 0x22b   : > { %v680_v15 = vpop.f32.mrf.mxu1 }
 0x22c   : > { %v704_v19 = vmax.f32 %v680_v15, 1e-06 }
 0x22d   : > { %v2215_v22 = vpop.f32.mrf.mxu1 }
 0x22e   : > { %2458 = vlog2.f32 %v704_v19 }
 0x22f   : > { %v685_v23 = vpop.f32.mrf.mxu1 }
 0x230   : > { %v705_v24 = vmax.f32 %v685_v23, 1e-06 }
 0x231   : > { %v2218_v27 = vpop.f32.mrf.mxu1 }
 0x232   : > { %2460 = vlog2.f32 %v705_v24 }
 0x233   : > { %v690_v28 = vpop.f32.mrf.mxu1 }
 0x234   : > { %v706_v29 = vmax.f32 %v690_v28, 1e-06  ;;  %v3303_v28 = vld [vmem:[%s3484_s6 + $0x68] sm:$0xff] }
 0x235   : > { %v2221_v30 = vpop.f32.mrf.mxu1 }
 0x236   : > { %2462 = vlog2.f32 %v706_v29  ;;  %v3308_v30 = vld [vmem:[%s3484_s6 + $0x70] sm:$0xff] }
 0x237   : > { %v695_v32 = vpop.f32.mrf.mxu1 }
 0x238   : > { %v707_v31 = vmax.f32 %v695_v32, 1e-06 }
 0x239   : > { %v2224_v5 = vpop.f32.mrf.mxu1 }
 0x23a   : > { %2464 = vlog2.f32 %v707_v31 }
 0x23b   : > { %v2459_v0 = vpop.eup %2458  ;;  %v700_v33 = vpop.f32.mrf.mxu1 }
 0x23c   : > { %v710_v36 = vmul.f32 0.6931472, %v2459_v0  ;;  %v708_v37 = vmax.f32 %v700_v33, 1e-06 }
 0x23d   : > { %v2227_v39 = vpop.f32.mrf.mxu1 }
 0x23e   : > { %2466 = vlog2.f32 %v708_v37  ;;  %v780_v40 = vmul.f32 %v3221_v34, %v710_v36  ;;  %v719_v41 = vmul.f32 %v710_v36, %v3226_v35  ;;  %v750_v44 = vmul.f32 %v3231_v38, %v710_v36  ;;  %v3317_v39 = vld [vmem:[%s3484_s6 + $0x48] sm:$0xff] }
 0x23f   : > { %v2461_v43 = vpop.eup %2460 }
 0x240   : > { %v712_v47 = vmul.f32 0.6931472, %v2461_v43  ;;  %v785_v25 = vsel %vm724_vm5, %v780_v40, 0.0  ;;  %v725_v48 = vsel %vm724_vm5, %v719_v41, 0.0  ;;  %v755_v61 = vsel %vm724_vm5, %v750_v44, 0.0 }
 0x241   : > { %786 = vadd.xlane.f32.xlu1 %v785_v25  ;;  %726 = vadd.xlane.f32.xlu0 %v725_v48 }
 0x242   : > { %v720_v58 = vmul.f32 %v712_v47, %v3239_v20  ;;  %v781_v45 = vmul.f32 %v3246_v57, %v712_v47  ;;  %v751_v1 = vmul.f32 %v3251_v26, %v712_v47 }
 0x243   : > { %v2463_v60 = vpop.eup %2462  ;;  %v1049_v42 = vpop.f32.mrf.mxu1 }
 0x244   : > { %v714_v62 = vmul.f32 0.6931472, %v2463_v60  ;;  %v1073_v63 = vmax.f32 %v1049_v42, 1e-06  ;;  %v728_v50 = vsel %vm724_vm5, %v720_v58, 0.0  ;;  %v788_v11 = vsel %vm724_vm5, %v781_v45, 0.0 }
 0x245   : > { %756 = vadd.xlane.f32.xlu0 %v755_v61  ;;  %729 = vadd.xlane.f32.xlu1 %v728_v50  ;;  %v2273_v6 = vpop.f32.mrf.mxu1  ;;  %v758_v46 = vsel %vm724_vm5, %v751_v1, 0.0 }
 0x246   : > { %2468 = vlog2.f32 %v1073_v63  ;;  %v782_v49 = vmul.f32 %v3261_v4, %v714_v62  ;;  %v721_v52 = vmul.f32 %v714_v62, %v3266_v7  ;;  %v752_v16 = vmul.f32 %v3275_v13, %v714_v62 }
 0x247   : > { %v2465_v10 = vpop.eup %2464  ;;  %v1054_v8 = vpop.f32.mrf.mxu1 }
 0x248   : > { %v716_v3 = vmul.f32 0.6931472, %v2465_v10  ;;  %v1074_v12 = vmax.f32 %v1054_v8, 1e-06  ;;  %v791_v55 = vsel %vm724_vm5, %v782_v49, 0.0  ;;  %v731_v56 = vsel %vm724_vm5, %v721_v52, 0.0 }
 0x249   : > { %789 = vadd.xlane.f32.xlu0 %v788_v11  ;;  %759 = vadd.xlane.f32.xlu1 %v758_v46  ;;  %v2276_v51 = vpop.f32.mrf.mxu1  ;;  %v761_v19 = vsel %vm724_vm5, %v752_v16, 0.0 }
 0x24a   : > { %2470 = vlog2.f32 %v1074_v12  ;;  %v753_v59 = vmul.f32 %v3280_v14, %v716_v3  ;;  %v722_v22 = vmul.f32 %v716_v3, %v3289_v2  ;;  %v783_v0 = vmul.f32 %v3303_v28, %v716_v3 }
 0x24b   : > { %v2467_v53 = vpop.eup %2466  ;;  %v1059_v54 = vpop.f32.mrf.mxu1 }
 0x24c   : > { %v718_v17 = vmul.f32 0.6931472, %v2467_v53  ;;  %v1075_v18 = vmax.f32 %v1059_v54, 1e-06  ;;  %v764_v24 = vsel %vm724_vm5, %v753_v59, 0.0  ;;  %v734_v5 = vsel %vm724_vm5, %v722_v22, 0.0 }
 0x24d   : > { %792 = vadd.xlane.f32.xlu1 %v791_v55  ;;  %732 = vadd.xlane.f32.xlu0 %v731_v56  ;;  %v2279_v21 = vpop.f32.mrf.mxu1  ;;  %v794_v43 = vsel %vm724_vm5, %v783_v0, 0.0 }
 0x24e   : > { %2472 = vlog2.f32 %v1075_v18  ;;  %v723_v27 = vmul.f32 %v718_v17, %v3294_v9  ;;  %v784_v37 = vmul.f32 %v3308_v30, %v718_v17  ;;  %v754_v44 = vmul.f32 %v3317_v39, %v718_v17 }
 0x24f   : > { %v1064_v15 = vpop.f32.mrf.mxu1 }
 0x250   : > { %v1076_v23 = vmax.f32 %v1064_v15, 1e-06  ;;  %v737_v36 = vsel %vm724_vm5, %v723_v27, 0.0  ;;  %v797_v48 = vsel %vm724_vm5, %v784_v37, 0.0  ;;  %v767_v42 = vsel %vm724_vm5, %v754_v44, 0.0 }
 0x251   : > { %762 = vadd.xlane.f32.xlu0 %v761_v19  ;;  %765 = vadd.xlane.f32.xlu1 %v764_v24  ;;  %v2282_v29 = vpop.f32.mrf.mxu1 }
 0x252   : > { %2474 = vlog2.f32 %v1076_v23 }
 0x253   : > { %v2469_v32 = vpop.eup %2468  ;;  %v1069_v31 = vpop.f32.mrf.mxu1 }
 0x254   : > { %v1079_v33 = vmul.f32 0.6931472, %v2469_v32  ;;  %v1077_v25 = vmax.f32 %v1069_v31, 1e-06 }
 0x255   : > { %735 = vadd.xlane.f32.xlu0 %v734_v5  ;;  %738 = vadd.xlane.f32.xlu1 %v737_v36  ;;  %v2285_v40 = vpop.f32.mrf.mxu1 }
 0x256   : > { %v1118_v58 = vmul.f32 %v3231_v38, %v1079_v33  ;;  %v1088_v61 = vmul.f32 %v1079_v33, %v3226_v35  ;;  %2476 = vlog2.f32 %v1077_v25  ;;  %v1148_v8 = vmul.f32 %v3221_v34, %v1079_v33 }
 0x257   : > { %v2471_v41 = vpop.eup %2470 }
 0x258   : > { %v1081_v47 = vmul.f32 0.6931472, %v2471_v41  ;;  %v1123_v62 = vsel %vm724_vm5, %v1118_v58, 0.0  ;;  %v1093_v10 = vsel %vm724_vm5, %v1088_v61, 0.0  ;;  %v1153_v51 = vsel %vm724_vm5, %v1148_v8, 0.0 }
 0x259   : > { %795 = vadd.xlane.f32.xlu0 %v794_v43  ;;  %798 = vadd.xlane.f32.xlu1 %v797_v48 }
 0x25a   : > { %v1089_v63 = vmul.f32 %v1081_v47, %v3239_v20  ;;  %v1149_v3 = vmul.f32 %v3246_v57, %v1081_v47  ;;  %v1119_v53 = vmul.f32 %v3251_v26, %v1081_v47 }
 0x25b   : > { %v1415_v60 = vpop.f32.mrf.mxu1  ;;  %v2473_v50 = vpop.eup %2472 }
 0x25c   : > { %v1439_v45 = vmax.f32 %v1415_v60, 1e-06  ;;  %v1083_v11 = vmul.f32 0.6931472, %v2473_v50  ;;  %v1096_v49 = vsel %vm724_vm5, %v1089_v63, 0.0  ;;  %v1156_v16 = vsel %vm724_vm5, %v1149_v3, 0.0 }
 0x25d   : > { %768 = vadd.xlane.f32.xlu0 %v767_v42  ;;  %1124 = vadd.xlane.f32.xlu1 %v1123_v62  ;;  %v2331_v1 = vpop.f32.mrf.mxu1  ;;  %v1126_v59 = vsel %vm724_vm5, %v1119_v53, 0.0 }
 0x25e   : > { %2478 = vlog2.f32 %v1439_v45  ;;  %v1120_v17 = vmul.f32 %v3275_v13, %v1083_v11  ;;  %v1090_v21 = vmul.f32 %v1083_v11, %v3266_v7  ;;  %v1150_v32 = vmul.f32 %v3261_v4, %v1083_v11 }
 0x25f   : > { %v1420_v6 = vpop.f32.mrf.mxu1  ;;  %v2475_v12 = vpop.eup %2474 }
 0x260   : > { %v1085_v54 = vmul.f32 0.6931472, %v2475_v12  ;;  %v1440_v55 = vmax.f32 %v1420_v6, 1e-06  ;;  %v1129_v19 = vsel %vm724_vm5, %v1120_v17, 0.0  ;;  %v1099_v29 = vsel %vm724_vm5, %v1090_v21, 0.0 }
 0x261   : > { %1094 = vadd.xlane.f32.xlu0 %v1093_v10  ;;  %1097 = vadd.xlane.f32.xlu1 %v1096_v49  ;;  %v2334_v46 = vpop.f32.mrf.mxu1  ;;  %v1159_v37 = vsel %vm724_vm5, %v1150_v32, 0.0 }
 0x262   : > { %2480 = vlog2.f32 %v1440_v55  ;;  %v1091_v22 = vmul.f32 %v1085_v54, %v3289_v2  ;;  %v1151_v0 = vmul.f32 %v3303_v28, %v1085_v54  ;;  %v1121_v40 = vmul.f32 %v3280_v14, %v1085_v54 }
 0x263   : > { %v1425_v52 = vpop.f32.mrf.mxu1  ;;  %v2477_v23 = vpop.eup %2476 }
 0x264   : > { %v1441_v15 = vmax.f32 %v1425_v52, 1e-06  ;;  %v1087_v31 = vmul.f32 0.6931472, %v2477_v23  ;;  %v1102_v5 = vsel %vm724_vm5, %v1091_v22, 0.0  ;;  %v1162_v44 = vsel %vm724_vm5, %v1151_v0, 0.0 }
 0x265   : > { %1154 = vadd.xlane.f32.xlu0 %v1153_v51  ;;  %1157 = vadd.xlane.f32.xlu1 %v1156_v16  ;;  %v2337_v18 = vpop.f32.mrf.mxu1  ;;  %v1132_v48 = vsel %vm724_vm5, %v1121_v40, 0.0 }
 0x266   : > { %2482 = vlog2.f32 %v1441_v15  ;;  %v1122_v47 = vmul.f32 %v3317_v39, %v1087_v31  ;;  %v1092_v58 = vmul.f32 %v1087_v31, %v3294_v9  ;;  %v1152_v1 = vmul.f32 %v3308_v30, %v1087_v31 }
 0x267   : > { %v1430_v56 = vpop.f32.mrf.mxu1 }
 0x268   : > { %v1442_v43 = vmax.f32 %v1430_v56, 1e-06  ;;  %v1135_v42 = vsel %vm724_vm5, %v1122_v47, 0.0  ;;  %v1105_v50 = vsel %vm724_vm5, %v1092_v58, 0.0  ;;  %v1165_v12 = vsel %vm724_vm5, %v1152_v1, 0.0 }
 0x269   : > { %1127 = vadd.xlane.f32.xlu0 %v1126_v59  ;;  %1130 = vadd.xlane.f32.xlu1 %v1129_v19  ;;  %v2340_v24 = vpop.f32.mrf.mxu1 }
 0x26a   : > { %2484 = vlog2.f32 %v1442_v43 }
 0x26b   : > { %v1435_v27 = vpop.f32.mrf.mxu1  ;;  %v2479_v33 = vpop.eup %2478 }
 0x26c   : > { %v1445_v41 = vmul.f32 0.6931472, %v2479_v33  ;;  %v1443_v60 = vmax.f32 %v1435_v27, 1e-06 }
 0x26d   : > { %1100 = vadd.xlane.f32.xlu0 %v1099_v29  ;;  %1103 = vadd.xlane.f32.xlu1 %v1102_v5  ;;  %v2343_v36 = vpop.f32.mrf.mxu1 }
 0x26e   : > { %v1454_v61 = vmul.f32 %v1445_v41, %v3226_v35  ;;  %2486 = vlog2.f32 %v1443_v60  ;;  %v1514_v8 = vmul.f32 %v3221_v34, %v1445_v41  ;;  %v1484_v46 = vmul.f32 %v3231_v38, %v1445_v41 }
 0x26f   : > { %v2481_v45 = vpop.eup %2480 }
 0x270   : > { %v1447_v6 = vmul.f32 0.6931472, %v2481_v45  ;;  %v1459_v10 = vsel %vm724_vm5, %v1454_v61, 0.0  ;;  %v1519_v53 = vsel %vm724_vm5, %v1514_v8, 0.0  ;;  %v1489_v17 = vsel %vm724_vm5, %v1484_v46, 0.0 }
 0x271   : > { %1160 = vadd.xlane.f32.xlu0 %v1159_v37  ;;  %1163 = vadd.xlane.f32.xlu1 %v1162_v44 }
 0x272   : > { %v1485_v54 = vmul.f32 %v3251_v26, %v1447_v6  ;;  %v1455_v18 = vmul.f32 %v1447_v6, %v3239_v20  ;;  %v1515_v24 = vmul.f32 %v3246_v57, %v1447_v6 }
 0x273   : > { %v1781_v25 = vpop.f32.mrf.mxu1  ;;  %v2483_v11 = vpop.eup %2482 }
 0x274   : > { %v1449_v52 = vmul.f32 0.6931472, %v2483_v11  ;;  %v1805_v56 = vmax.f32 %v1781_v25, 1e-06  ;;  %v1492_v59 = vsel %vm724_vm5, %v1485_v54, 0.0  ;;  %v1462_v23 = vsel %vm724_vm5, %v1455_v18, 0.0 }
 0x275   : > { %1133 = vadd.xlane.f32.xlu0 %v1132_v48  ;;  %1136 = vadd.xlane.f32.xlu1 %v1135_v42  ;;  %v2389_v62 = vpop.f32.mrf.mxu1  ;;  %v1522_v0 = vsel %vm724_vm5, %v1515_v24, 0.0 }
 0x276   : > { %v1456_v21 = vmul.f32 %v1449_v52, %v3266_v7  ;;  %v1516_v32 = vmul.f32 %v3261_v4, %v1449_v52  ;;  %v1486_v33 = vmul.f32 %v3275_v13, %v1449_v52 }
 0x277   : > { %v1786_v63 = vpop.f32.mrf.mxu1  ;;  %v2485_v15 = vpop.eup %2484 }
 0x278   : > { %v1806_v51 = vmax.f32 %v1786_v63, 1e-06  ;;  %v1451_v27 = vmul.f32 0.6931472, %v2485_v15  ;;  %v1465_v29 = vsel %vm724_vm5, %v1456_v21, 0.0  ;;  %v1525_v40 = vsel %vm724_vm5, %v1516_v32, 0.0 }
 0x279   : > { %1106 = vadd.xlane.f32.xlu0 %v1105_v50  ;;  %1460 = vadd.xlane.f32.xlu1 %v1459_v10  ;;  %v2392_v49 = vpop.f32.mrf.mxu1  ;;  %v1495_v43 = vsel %vm724_vm5, %v1486_v33, 0.0 }
 0x27a   : > { %2488 = vlog2.f32 %v1806_v51  ;;  %v1487_v41 = vmul.f32 %v3280_v14, %v1451_v27  ;;  %v1457_v44 = vmul.f32 %v1451_v27, %v3289_v2  ;;  %v1517_v42 = vmul.f32 %v3303_v28, %v1451_v27 }
 0x27b   : > { %v1791_v3 = vpop.f32.mrf.mxu1  ;;  %2490 = vlog2.f32 %v1805_v56  ;;  %v2487_v31 = vpop.eup %2486 }
 0x27c   : > { %v1453_v36 = vmul.f32 0.6931472, %v2487_v31  ;;  %v1807_v37 = vmax.f32 %v1791_v3, 1e-06  ;;  %v1498_v25 = vsel %vm724_vm5, %v1487_v41, 0.0  ;;  %v1468_v60 = vsel %vm724_vm5, %v1457_v44, 0.0 }
 0x27d   : > { %1166 = vadd.xlane.f32.xlu0 %v1165_v12  ;;  %1520 = vadd.xlane.f32.xlu1 %v1519_v53  ;;  %v2395_v55 = vpop.f32.mrf.mxu1  ;;  %v1528_v50 = vsel %vm724_vm5, %v1517_v42, 0.0 }
 0x27e   : > { %2492 = vlog2.f32 %v1807_v37  ;;  %v1458_v48 = vmul.f32 %v1453_v36, %v3294_v9  ;;  %v1518_v62 = vmul.f32 %v3308_v30, %v1453_v36  ;;  %v1488_v1 = vmul.f32 %v3317_v39, %v1453_v36 }
 0x27f   : > { %v1796_v16 = vpop.f32.mrf.mxu1 }
 0x280   : > { %v1808_v47 = vmax.f32 %v1796_v16, 1e-06  ;;  %v1471_v45 = vsel %vm724_vm5, %v1458_v48, 0.0  ;;  %v1531_v8 = vsel %vm724_vm5, %v1518_v62, 0.0  ;;  %v1501_v49 = vsel %vm724_vm5, %v1488_v1, 0.0 }
 0x281   : > { %1490 = vadd.xlane.f32.xlu0 %v1489_v17  ;;  %1493 = vadd.xlane.f32.xlu1 %v1492_v59  ;;  %v2398_v19 = vpop.f32.mrf.mxu1 }
 0x282   : > { %2494 = vlog2.f32 %v1808_v47 }
 0x283   : > { %v1801_v22 = vpop.f32.mrf.mxu1 }
 0x284   : > { %v1809_v10 = vmax.f32 %v1801_v22, 1e-06 }
 0x285   : > { %1463 = vadd.xlane.f32.xlu0 %v1462_v23  ;;  %1466 = vadd.xlane.f32.xlu1 %v1465_v29  ;;  %v2401_v5 = vpop.f32.mrf.mxu1 }
 0x286   : > { %2496 = vlog2.f32 %v1809_v10 }
 0x287   : > { %v2489_v58 = vpop.eup %2488 }
 0x288   : > { %v1813_v61 = vmul.f32 0.6931472, %v2489_v58  ;;  %v2491_v63 = vpop.eup %2490 }
 0x289   : > { %1523 = vadd.xlane.f32.xlu0 %v1522_v0  ;;  %1526 = vadd.xlane.f32.xlu1 %v1525_v40  ;;  %v1811_v6 = vmul.f32 0.6931472, %v2491_v63 }
 0x28a   : > { %v1821_v11 = vmul.f32 %v1813_v61, %v3239_v20  ;;  %v1851_v46 = vmul.f32 %v3251_v26, %v1813_v61  ;;  %v1881_v55 = vmul.f32 %v3246_v57, %v1813_v61 }
 0x28b   : > { %v1820_v12 = vmul.f32 %v1811_v6, %v3226_v35  ;;  %v2493_v52 = vpop.eup %2492  ;;  %v1850_v51 = vmul.f32 %v3231_v38, %v1811_v6  ;;  %v1880_v17 = vmul.f32 %v3221_v34, %v1811_v6 }
 0x28c   : > { %v1828_v3 = vsel %vm724_vm5, %v1821_v11, 0.0  ;;  %v1815_v53 = vmul.f32 0.6931472, %v2493_v52  ;;  %v1858_v20 = vsel %vm724_vm5, %v1851_v46, 0.0  ;;  %v1888_v18 = vsel %vm724_vm5, %v1881_v55, 0.0 }
 0x28d   : > { %1496 = vadd.xlane.f32.xlu0 %v1495_v43  ;;  %1499 = vadd.xlane.f32.xlu1 %v1498_v25  ;;  %v1825_v54 = vsel %vm724_vm5, %v1820_v12, 0.0  ;;  %v1855_v26 = vsel %vm724_vm5, %v1850_v51, 0.0  ;;  %v1885_v38 = vsel %vm724_vm5, %v1880_v17, 0.0 }
 0x28e   : > { %v1852_v56 = vmul.f32 %v3275_v13, %v1815_v53  ;;  %v1822_v57 = vmul.f32 %v1815_v53, %v3266_v7  ;;  %v1882_v34 = vmul.f32 %v3261_v4, %v1815_v53 }
 0x28f   : > { %v2495_v16 = vpop.eup %2494 }
 0x290   : > { %v1817_v35 = vmul.f32 0.6931472, %v2495_v16  ;;  %v1861_v59 = vsel %vm724_vm5, %v1852_v56, 0.0  ;;  %v1831_v22 = vsel %vm724_vm5, %v1822_v57, 0.0  ;;  %v1891_v24 = vsel %vm724_vm5, %v1882_v34, 0.0 }
 0x291   : > { %1469 = vadd.xlane.f32.xlu0 %v1468_v60  ;;  %1472 = vadd.xlane.f32.xlu1 %v1471_v45 }
 0x292   : > { %v1823_v21 = vmul.f32 %v1817_v35, %v3289_v2  ;;  %v1883_v23 = vmul.f32 %v3303_v28, %v1817_v35  ;;  %v1853_v2 = vmul.f32 %v3280_v14, %v1817_v35 }
 0x293   : > { %v2497_v15 = vpop.eup %2496 }
 0x294   : > { %v1819_v19 = vmul.f32 0.6931472, %v2497_v15  ;;  %v1834_v13 = vsel %vm724_vm5, %v1823_v21, 0.0  ;;  %v1894_v7 = vsel %vm724_vm5, %v1883_v23, 0.0  ;;  %v1864_v4 = vsel %vm724_vm5, %v1853_v2, 0.0 }
 0x295   : > { %1529 = vadd.xlane.f32.xlu0 %v1528_v50  ;;  %1532 = vadd.xlane.f32.xlu1 %v1531_v8 }
 0x296   : > { %v1854_v27 = vmul.f32 %v3317_v39, %v1819_v19  ;;  %v1824_v32 = vmul.f32 %v1819_v19, %v3294_v9  ;;  %v1884_v31 = vmul.f32 %v3308_v30, %v1819_v19 }
 0x298   : > { %v1867_v29 = vsel %vm724_vm5, %v1854_v27, 0.0  ;;  %v1837_v28 = vsel %vm724_vm5, %v1824_v32, 0.0  ;;  %v1897_v5 = vsel %vm724_vm5, %v1884_v31, 0.0 }
 0x299   : > { %1502 = vadd.xlane.f32.xlu0 %v1501_v49  ;;  %1829 = vadd.xlane.f32.xlu1 %v1828_v3 }
 0x29d   : > { %1826 = vadd.xlane.f32.xlu0 %v1825_v54  ;;  %1859 = vadd.xlane.f32.xlu1 %v1858_v20 }
 0x2a1   : > { %1856 = vadd.xlane.f32.xlu0 %v1855_v26  ;;  %1889 = vadd.xlane.f32.xlu1 %v1888_v18 }
 0x2a5   : > { %1886 = vadd.xlane.f32.xlu0 %v1885_v38  ;;  %1862 = vadd.xlane.f32.xlu1 %v1861_v59 }
 0x2a9   : > { %1832 = vadd.xlane.f32.xlu0 %v1831_v22  ;;  %1835 = vadd.xlane.f32.xlu1 %v1834_v13 }
 0x2ad   : > { %1892 = vadd.xlane.f32.xlu0 %v1891_v24  ;;  %1895 = vadd.xlane.f32.xlu1 %v1894_v7 }
 0x2b1   : > { %1865 = vadd.xlane.f32.xlu0 %v1864_v4  ;;  %1868 = vadd.xlane.f32.xlu1 %v1867_v29 }
 0x2b5   : > { %1838 = vadd.xlane.f32.xlu0 %v1837_v28 }
 0x2b9   : > { %1898 = vadd.xlane.f32.xlu0 %v1897_v5 }
 0x2ca   : > { %v727_v14 = vpop.xlane.xlu0 %726  ;;  %v787_v39 = vpop.xlane.xlu1 %786 }
 0x2ce   : > { %v757_v0 = vpop.xlane.xlu0 %756  ;;  %v730_v33 = vpop.xlane.xlu1 %729 }
 0x2cf   : > { %v740_v36 = vadd.f32 %v730_v33, %v727_v14 }
 0x2d2   : > { %v790_v37 = vpop.xlane.xlu0 %789  ;;  %v760_v40 = vpop.xlane.xlu1 %759 }
 0x2d3   : > { %v800_v41 = vadd.f32 %v790_v37, %v787_v39  ;;  %v770_v43 = vadd.f32 %v760_v40, %v757_v0 }
 0x2d6   : > { %v733_v9 = vpop.xlane.xlu0 %732  ;;  %v793_v44 = vpop.xlane.xlu1 %792 }
 0x2d7   : > { %v741_v47 = vadd.f32 %v740_v36, %v733_v9  ;;  %v801_v25 = vadd.f32 %v800_v41, %v793_v44 }
 0x2da   : > { %v763_v48 = vpop.xlane.xlu0 %762  ;;  %v766_v58 = vpop.xlane.xlu1 %765 }
 0x2db   : > { %v771_v30 = vadd.f32 %v770_v43, %v763_v48 }
 0x2dd   : > { %v772_v60 = vadd.f32 %v771_v30, %v766_v58 }
 0x2de   : > { %v736_v42 = vpop.xlane.xlu0 %735  ;;  %v739_v61 = vpop.xlane.xlu1 %738 }
 0x2df   : > { %v742_v45 = vadd.f32 %v741_v47, %v736_v42 }
 0x2e1   : > { %v743_v62 = vadd.f32 %v742_v45, %v739_v61 }
 0x2e2   : > { %v796_v63 = vpop.xlane.xlu0 %795  ;;  %v799_v50 = vpop.xlane.xlu1 %798 }
 0x2e3   : > { %v744_v1 = vrot.slane %v743_v62, 4  ;;  %v802_v6 = vadd.f32 %v801_v25, %v796_v63 }
 0x2e5   : > { %v745_v10 = vadd.f32 %v744_v1, %v743_v62  ;;  %v803_v8 = vadd.f32 %v802_v6, %v799_v50 }
 0x2e6   : > { %v769_v11 = vpop.xlane.xlu0 %768  ;;  %v1125_v49 = vpop.xlane.xlu1 %1124 }
 0x2e7   : > { %v746_v3 = vrot.slane %v745_v10, 2  ;;  %v804_v12 = vrot.slane %v803_v8, 4  ;;  %v773_v46 = vadd.f32 %v772_v60, %v769_v11 }
 0x2e9   : > { %v805_v52 = vadd.f32 %v804_v12, %v803_v8  ;;  %v774_v51 = vrot.slane %v773_v46, 4  ;;  %v747_v20 = vadd.f32 %v746_v3, %v745_v10 }
 0x2ea   : > { %v1095_v53 = vpop.xlane.xlu0 %1094  ;;  %v1098_v54 = vpop.xlane.xlu1 %1097 }
 0x2eb   : > { %v806_v55 = vrot.slane %v805_v52, 2  ;;  %v775_v16 = vadd.f32 %v774_v51, %v773_v46  ;;  %v1108_v17 = vadd.f32 %v1098_v54, %v1095_v53  ;;  %v748_v38 = vrot.slane %v747_v20, 1 }
 0x2ed   : > { %v807_v35 = vadd.f32 %v806_v55, %v805_v52  ;;  %v776_v26 = vrot.slane %v775_v16, 2  ;;  %v749_v22 = vadd.f32 %v748_v38, %v747_v20 }
 0x2ee   : > { %v1155_v18 = vpop.xlane.xlu0 %1154  ;;  %v1158_v56 = vpop.xlane.xlu1 %1157 }
 0x2ef   : > { %v777_v59 = vadd.f32 %v776_v26, %v775_v16  ;;  %v1168_v57 = vadd.f32 %v1158_v56, %v1155_v18  ;;  %v808_v21 = vrot.slane %v807_v35, 1 }
 0x2f1   : > { %v778_v15 = vrot.slane %v777_v59, 1  ;;  %v809_v24 = vadd.f32 %v808_v21, %v807_v35 }
 0x2f2   : > { %v1128_v34 = vpop.xlane.xlu0 %1127  ;;  %v1131_v19 = vpop.xlane.xlu1 %1130 }
 0x2f3   : > { %v779_v13 = vadd.f32 %v778_v15, %v777_v59  ;;  %v1138_v23 = vadd.f32 %v1128_v34, %v1125_v49 }
 0x2f5   : > { %v811_v7 = vsel %vm810_vm6, %v749_v22, %v779_v13  ;;  %v1139_v2 = vadd.f32 %v1138_v23, %v1131_v19 }
 0x2f6   : > { %v813_v27 = vsel %vm812_vm7, %v811_v7, %v809_v24  ;;  %v1101_v4 = vpop.xlane.xlu0 %1100  ;;  %v1104_v29 = vpop.xlane.xlu1 %1103 }
 0x2f7   : > { %v1109_v32 = vadd.f32 %v1108_v17, %v1101_v4  ;;  %v814_v16 = vsel %vm724_vm5, %v813_v27, 0.0  ;;  %v3421_v17 = vld [vmem:[%s3485_s7] sm:$0x1] }
 0x2f8   : > { %v815_v38 = vadd.f32 %v814_v16, %v3421_v17 }
 0x2f9   : > { %v1110_v28 = vadd.f32 %v1109_v32, %v1104_v29 }
 0x2fa   : > { %v1161_v31 = vpop.xlane.xlu0 %1160  ;;  %v1164_v5 = vpop.xlane.xlu1 %1163 }
 0x2fb   : > { %v1169_v14 = vadd.f32 %v1168_v57, %v1161_v31 }
 0x2fd   : > { %v1170_v9 = vadd.f32 %v1169_v14, %v1164_v5 }
 0x2fe   : > { %v1134_v39 = vpop.xlane.xlu0 %1133  ;;  %v1137_v0 = vpop.xlane.xlu1 %1136 }
 0x2ff   : > { %v1140_v33 = vadd.f32 %v1139_v2, %v1134_v39 }
 0x301   : > { %v1141_v36 = vadd.f32 %v1140_v33, %v1137_v0 }
 0x302   : > { %v1107_v37 = vpop.xlane.xlu0 %1106  ;;  %v1461_v40 = vpop.xlane.xlu1 %1460 }
 0x303   : > { %v1142_v41 = vrot.slane %v1141_v36, 4  ;;  %v1111_v43 = vadd.f32 %v1110_v28, %v1107_v37 }
 0x305   : > { %v1143_v44 = vadd.f32 %v1142_v41, %v1141_v36  ;;  %v1112_v47 = vrot.slane %v1111_v43, 4 }
 0x306   : > { %v1167_v25 = vpop.xlane.xlu0 %1166  ;;  %v1521_v48 = vpop.xlane.xlu1 %1520 }
 0x307   : > { %v1144_v58 = vrot.slane %v1143_v44, 2  ;;  %v1113_v30 = vadd.f32 %v1112_v47, %v1111_v43  ;;  %v1171_v60 = vadd.f32 %v1170_v9, %v1167_v25 }
 0x309   : > { %v1145_v42 = vadd.f32 %v1144_v58, %v1143_v44  ;;  %v1114_v61 = vrot.slane %v1113_v30, 2  ;;  %v1172_v45 = vrot.slane %v1171_v60, 4 }
 0x30a   : > { %v1491_v62 = vpop.xlane.xlu0 %1490  ;;  %v1494_v63 = vpop.xlane.xlu1 %1493 }
 0x30b   : > { %v1146_v50 = vrot.slane %v1145_v42, 1  ;;  %v1115_v1 = vadd.f32 %v1114_v61, %v1113_v30  ;;  %v1173_v6 = vadd.f32 %v1172_v45, %v1171_v60  ;;  %v1504_v22 = vadd.f32 %v1494_v63, %v1491_v62 }
 0x30d   : > { %v1116_v10 = vrot.slane %v1115_v1, 1  ;;  %v1174_v8 = vrot.slane %v1173_v6, 2  ;;  %v1147_v3 = vadd.f32 %v1146_v50, %v1145_v42 }
 0x30e   : > { %v1464_v11 = vpop.xlane.xlu0 %1463  ;;  %v1467_v49 = vpop.xlane.xlu1 %1466 }
 0x30f   : > { %v1117_v12 = vadd.f32 %v1116_v10, %v1115_v1  ;;  %v1175_v46 = vadd.f32 %v1174_v8, %v1173_v6  ;;  %v1474_v13 = vadd.f32 %v1464_v11, %v1461_v40 }
 0x311   : > { %v1178_v52 = vsel %vm810_vm6, %v1117_v12, %v1147_v3  ;;  %v1176_v51 = vrot.slane %v1175_v46, 1  ;;  %v1475_v27 = vadd.f32 %v1474_v13, %v1467_v49 }
 0x312   : > { %v1524_v53 = vpop.xlane.xlu0 %1523  ;;  %v1527_v54 = vpop.xlane.xlu1 %1526 }
 0x313   : > { %v1177_v20 = vadd.f32 %v1176_v51, %v1175_v46  ;;  %v1534_v2 = vadd.f32 %v1524_v53, %v1521_v48 }
 0x315   : > { %v1179_v55 = vsel %vm812_vm7, %v1178_v52, %v1177_v20  ;;  %v1535_v31 = vadd.f32 %v1534_v2, %v1527_v54 }
 0x316   : > { %v1180_v35 = vsel %vm724_vm5, %v1179_v55, 0.0  ;;  %v1497_v26 = vpop.xlane.xlu0 %1496  ;;  %v1500_v18 = vpop.xlane.xlu1 %1499 }
 0x317   : > { %v1181_v56 = vadd.f32 %v1180_v35, %v3421_v17  ;;  %v1505_v7 = vadd.f32 %v1504_v22, %v1497_v26 }
 0x319   : > { %v1915_v59 = vrot.slane %v1181_v56, 7  ;;  %v1506_v32 = vadd.f32 %v1505_v7, %v1500_v18 }
 0x31a   : > { %v1470_v57 = vpop.xlane.xlu0 %1469  ;;  %v1473_v21 = vpop.xlane.xlu1 %1472 }
 0x31b   : > { %v3427_v15 = vsel %vm610_vm1, %v815_v38, %v1915_v59  ;;  %v1476_v28 = vadd.f32 %v1475_v27, %v1470_v57 }
 0x31d   : > { %v1477_v33 = vadd.f32 %v1476_v28, %v1473_v21 }
 0x31e   : > { %v1530_v34 = vpop.xlane.xlu0 %1529  ;;  %v1533_v19 = vpop.xlane.xlu1 %1532 }
 0x31f   : > { %v1536_v14 = vadd.f32 %v1535_v31, %v1530_v34  ;;  %v1478_v40 = vrot.slane %v1477_v33, 4 }
 0x321   : > { %v1537_v37 = vadd.f32 %v1536_v14, %v1533_v19  ;;  %v1479_v48 = vadd.f32 %v1478_v40, %v1477_v33 }
 0x322   : > { %v1503_v23 = vpop.xlane.xlu0 %1502  ;;  %v1830_v24 = vpop.xlane.xlu1 %1829 }
 0x323   : > { %v1507_v5 = vadd.f32 %v1506_v32, %v1503_v23  ;;  %v1538_v44 = vrot.slane %v1537_v37, 4  ;;  %v1480_v61 = vrot.slane %v1479_v48, 2 }
 0x325   : > { %v1508_v36 = vrot.slane %v1507_v5, 4  ;;  %v1539_v30 = vadd.f32 %v1538_v44, %v1537_v37  ;;  %v1481_v8 = vadd.f32 %v1480_v61, %v1479_v48 }
 0x326   : > { %v1827_v4 = vpop.xlane.xlu0 %1826  ;;  %v1860_v29 = vpop.xlane.xlu1 %1859 }
 0x327   : > { %v1509_v9 = vadd.f32 %v1508_v36, %v1507_v5  ;;  %v1840_v45 = vadd.f32 %v1830_v24, %v1827_v4  ;;  %v1540_v6 = vrot.slane %v1539_v30, 2  ;;  %v1482_v20 = vrot.slane %v1481_v8, 1 }
 0x329   : > { %v1510_v58 = vrot.slane %v1509_v9, 2  ;;  %v1541_v53 = vadd.f32 %v1540_v6, %v1539_v30  ;;  %v1483_v57 = vadd.f32 %v1482_v20, %v1481_v8 }
 0x32a   : > { %v1857_v39 = vpop.xlane.xlu0 %1856  ;;  %v1890_v0 = vpop.xlane.xlu1 %1889 }
 0x32b   : > { %v1870_v62 = vadd.f32 %v1860_v29, %v1857_v39  ;;  %v1511_v63 = vadd.f32 %v1510_v58, %v1509_v9  ;;  %v1542_v38 = vrot.slane %v1541_v53, 1 }
 0x32d   : > { %v1512_v12 = vrot.slane %v1511_v63, 1  ;;  %v1543_v24 = vadd.f32 %v1542_v38, %v1541_v53 }
 0x32e   : > { %v1887_v41 = vpop.xlane.xlu0 %1886  ;;  %v1863_v43 = vpop.xlane.xlu1 %1862 }
 0x32f   : > { %v1871_v50 = vadd.f32 %v1870_v62, %v1863_v43  ;;  %v1900_v11 = vadd.f32 %v1890_v0, %v1887_v41  ;;  %v1513_v35 = vadd.f32 %v1512_v12, %v1511_v63 }
 0x331   : > { %v1544_v22 = vsel %vm810_vm6, %v1483_v57, %v1513_v35 }
 0x332   : > { %v1833_v47 = vpop.xlane.xlu0 %1832  ;;  %v1836_v25 = vpop.xlane.xlu1 %1835  ;;  %v1545_v4 = vsel %vm812_vm7, %v1544_v22, %v1543_v24 }
 0x333   : > { %v1841_v1 = vadd.f32 %v1840_v45, %v1833_v47  ;;  %v1546_v5 = vsel %vm724_vm5, %v1545_v4, 0.0 }
 0x334   : > { %v1547_v33 = vadd.f32 %v1546_v5, %v3421_v17 }
 0x335   : > { %v1842_v46 = vadd.f32 %v1841_v1, %v1836_v25 }
 0x336   : > { %v1893_v60 = vpop.xlane.xlu0 %1892  ;;  %v1896_v42 = vpop.xlane.xlu1 %1895  ;;  %v1918_v40 = vrot.slane %v1547_v33, 6 }
 0x337   : > { %v1901_v52 = vadd.f32 %v1900_v11, %v1893_v60 }
 0x338   : > { %v1925_v47 = vsel %vm1924_vm8, %v3427_v15, %v1918_v40 }
 0x339   : > { %v1902_v26 = vadd.f32 %v1901_v52, %v1896_v42 }
 0x33a   : > { %v1866_v10 = vpop.xlane.xlu0 %1865  ;;  %v1869_v3 = vpop.xlane.xlu1 %1868 }
 0x33b   : > { %v1872_v49 = vadd.f32 %v1871_v50, %v1866_v10 }
 0x33d   : > { %v1873_v51 = vadd.f32 %v1872_v49, %v1869_v3 }
 0x33e   : > { %v1839_v54 = vpop.xlane.xlu0 %1838 }
 0x33f   : > { %v1874_v55 = vrot.slane %v1873_v51, 4  ;;  %v1843_v16 = vadd.f32 %v1842_v46, %v1839_v54 }
 0x341   : > { %v1875_v18 = vadd.f32 %v1874_v55, %v1873_v51  ;;  %v1844_v56 = vrot.slane %v1843_v16, 4 }
 0x342   : > { %v1899_v59 = vpop.xlane.xlu0 %1898 }
 0x343   : > { %v1876_v21 = vrot.slane %v1875_v18, 2  ;;  %v1845_v34 = vadd.f32 %v1844_v56, %v1843_v16  ;;  %v1903_v19 = vadd.f32 %v1902_v26, %v1899_v59 }
 0x345   : > { %v1846_v13 = vrot.slane %v1845_v34, 2  ;;  %v1904_v23 = vrot.slane %v1903_v19, 4  ;;  %v1877_v7 = vadd.f32 %v1876_v21, %v1875_v18 }
 0x347   : > { %v1847_v2 = vadd.f32 %v1846_v13, %v1845_v34  ;;  %v1905_v27 = vadd.f32 %v1904_v23, %v1903_v19  ;;  %v1878_v28 = vrot.slane %v1877_v7, 1 }
 0x349   : > { %v1848_v29 = vrot.slane %v1847_v2, 1  ;;  %v1906_v32 = vrot.slane %v1905_v27, 2  ;;  %v1879_v0 = vadd.f32 %v1878_v28, %v1877_v7 }
 0x34b   : > { %v1907_v31 = vadd.f32 %v1906_v32, %v1905_v27  ;;  %v1849_v14 = vadd.f32 %v1848_v29, %v1847_v2 }
 0x34d   : > { %v1908_v39 = vrot.slane %v1907_v31, 1  ;;  %v1910_v37 = vsel %vm810_vm6, %v1849_v14, %v1879_v0 }
 0x34f   : > { %v1909_v36 = vadd.f32 %v1908_v39, %v1907_v31 }
 0x351   : > { %v1911_v41 = vsel %vm812_vm7, %v1910_v37, %v1909_v36 }
 0x352   : > { %v1912_v43 = vsel %vm724_vm5, %v1911_v41, 0.0 }
 0x353   : > { %v1913_v9 = vadd.f32 %v1912_v43, %v3421_v17 }
 0x355   : > { %v1921_v44 = vrot.slane %v1913_v9, 5 }
 0x357   : > { %v1927_v25 = vsel %vm1926_vm9, %v1925_v47, %v1921_v44 }
 0x358   : > { %1928 = vst [vmem:[%s299_s19] sm:$0xf] %v1927_v25 }
 0x359   : > { %2511 = shalt.err (!%p2508_p3)
}
 0x35a   : > { %s2512_s12 = scalar_lea.hbm %s3443_s23, 64  ;;  %s2516_s18 = scalar_lea.hbm %s3486_s8, 128 }
 0x35b   : > { %p2513_p4 = scmp.ne.s32.totalorder %s3443_s23, %s2512_s12  ;;  %p2517_p9 = scmp.lt.s32.totalorder %s3443_s23, %s3486_s8 }
 0x35c   : > { %p2518_p10 = scmp.lt.s32.totalorder %s2516_s18, %s2512_s12 }
 0x35d   : > { %p2514_p7 = pnand %p2513_p4, %p2659_p5 }
 0x35e   : > { %p2519_p11 = por %p2518_p10, %p2517_p9 }
 0x35f   : > { %p2515_p8 = pneg %p2514_p7 }
 0x361   : > { %p2520_p12 = pnand %p2519_p11, %p2515_p8 }
 0x363   : > { %2523 = shalt.err (!%p2520_p12)
}
 0x364   : > { %2402 = dma.vmem_to_hbm [thread:$0]  (%p2659_p5), %s1944_s20, 64, %s3443_s23, %s1930_s24  }
 0x365 PF: > { %p2408_p13 = scmp.ge.s32.totalorder %s2558_s30, 2  ;;  %s1955_s22 = sand.u32 1, %s2546_s27  }
 0x366   : > { %s1956_s25 = scalar_lea.sflag [#allocation3], %s1955_s22 }
 0x367   : > { %p2405_p0 = pnand %p2408_p13, %p2663_p6 }
 0x369   : > { %p2406_p1 = pneg %p2405_p0 }
 0x36b   : > { %2541 = dma.done.wait (%p2406_p1), %s1956_s25, 64  }
 0x36c   : > { %2543 = vsyncadd (%p2406_p1), %s1956_s25, 4294967232  ;;  %p18_p2 = scmp.ge.s32.totalorder %s2646_s11, 4   ;;  %s3489_s27 = smov %s2550_s28 }
 0x36d   : > { %s3490_s28 = smov %s2554_s29  ;;  %s3491_s29 = smov %s2657_s14 }
 0x36e   : > { %s3492_s30 = smov %s2646_s11  ;;  %20 = sbr.rel (!%p18_p2) target bundleno = 3 (0x3), region = 92 }
 0x373   :  { %1961 = vsyncpa [#allocation3], 1 }
 0x374   :  { %1963 = vsyncpa [#allocation3 + $0x1], 1 }

</bundles_post_ra>
